<compile_context>
chip_gen: v5e
topology: v5e:2x2
jax: 0.10.0
libtpu: 0.0.40
codegen_flags: <defaults>
</compile_context>

<pallas_src>
import functools

import jax
import jax.numpy as jnp
from jax.experimental import pallas as pl
from jax.experimental.pallas import tpu as pltpu

LAYER_NORM_EPS = 1e-7        # ToxicModel overrides roberta's default to 1e-07
NUM_CLASSES = 6
HEAD_PAD = 128               # pad classifier out-dim to a full lane width
VMEM_LIMIT_BYTES = 48 * 1024 * 1024


# ------------------------- small in-kernel helpers -------------------------

def _ln(x, g, b):
    # LayerNorm with f32 statistics.
    mu = jnp.mean(x, axis=-1, keepdims=True)
    var = jnp.mean(jnp.square(x - mu), axis=-1, keepdims=True)
    return (x - mu) * jax.lax.rsqrt(var + LAYER_NORM_EPS) * g + b


def _erf(x):
    # Abramowitz & Stegun 7.1.26 polynomial, |err| <= 1.5e-7: keeps the erf-based GELU
    # RoBERTa uses while relying only on abs/exp/mul/add/select (VPU + EUP).
    ax = jnp.abs(x)
    t = 1.0 / (1.0 + 0.3275911 * ax)
    poly = ((((1.061405429 * t - 1.453152027) * t + 1.421413741) * t
             - 0.284496736) * t + 0.254829592) * t
    y = 1.0 - poly * jnp.exp(-ax * ax)
    return jnp.where(x < 0, -y, y)


def _gelu_erf(x):
    return 0.5 * x * (1.0 + _erf(x * 0.7071067811865476))


# ------------------------- fused encoder-layer math -------------------------

def _layer_math(x_bf16, bias2d, wqkv, wo, w1, w2, vecs, *, nH, dh, inter, first):
    """One transformer encoder layer on a single (S, H) batch element.  Returns f32."""
    H = nH * dh
    three_h = 3 * H

    # packed bias / LN-parameter slab (one DMA for all the tiny vectors)
    bqkv = vecs[0:1, :three_h]
    b1 = vecs[1:2, :inter]
    bo = vecs[2:3, :H]
    ln1g = vecs[3:4, :H]
    ln1b = vecs[4:5, :H]
    b2 = vecs[5:6, :H]
    ln2g = vecs[6:7, :H]
    ln2b = vecs[7:8, :H]

    x = x_bf16.astype(jnp.float32)
    if first:
        # embedding LayerNorm folded into the first layer's kernel (rows 8/9 of slab)
        x = _ln(x, vecs[8:9, :H], vecs[9:10, :H])
    x_bf = x.astype(jnp.bfloat16)

    # fused Q/K/V projection: single MXU pass with N = 3H (Q pre-scaled by 1/sqrt(dh))
    qkv = jnp.dot(x_bf, wqkv, preferred_element_type=jnp.float32) + bqkv     # (S, 3H)

    heads = []
    for h in range(nH):
        c0 = h * dh
        qh = qkv[:, c0:c0 + dh].astype(jnp.bfloat16)
        kh = qkv[:, H + c0:H + c0 + dh].astype(jnp.bfloat16)
        vh = qkv[:, 2 * H + c0:2 * H + c0 + dh].astype(jnp.bfloat16)
        # q . k^T without materializing a transpose: contract on dh of both operands
        s = jax.lax.dot_general(qh, kh, (((1,), (1,)), ((), ())),
                                preferred_element_type=jnp.float32) + bias2d
        m = jnp.max(s, axis=-1, keepdims=True)
        p = jnp.exp(s - m)                                   # softmax stays in f32
        denom = jnp.sum(p, axis=-1, keepdims=True)
        o = jnp.dot(p.astype(jnp.bfloat16), vh, preferred_element_type=jnp.float32)
        heads.append(o * pl.reciprocal(denom, approx=True))

    # lane-dense (S, H) context value -> out-projection; no masked scratch stores
    ctx = jnp.concatenate(heads, axis=-1).astype(jnp.bfloat16)
    attn = jnp.dot(ctx, wo, preferred_element_type=jnp.float32) + bo
    y = _ln(x + attn, ln1g, ln1b)

    h1 = jnp.dot(y.astype(jnp.bfloat16), w1, preferred_element_type=jnp.float32) + b1
    h1 = _gelu_erf(h1)                                        # erf GELU (RoBERTa)
    ffn = jnp.dot(h1.astype(jnp.bfloat16), w2, preferred_element_type=jnp.float32) + b2
    return _ln(y + ffn, ln2g, ln2b)                           # (S, H) f32


def _encoder_layer_kernel(x_ref, bias_ref, wqkv_ref, wo_ref, w1_ref, w2_ref, vecs_ref,
                          o_ref, *, nH, dh, inter, first):
    y = _layer_math(x_ref[...], bias_ref[0], wqkv_ref[...], wo_ref[...],
                    w1_ref[...], w2_ref[...], vecs_ref[...],
                    nH=nH, dh=dh, inter=inter, first=first)
    o_ref[...] = y.astype(o_ref.dtype)                        # bf16 inter-layer acts


def _encoder_last_kernel(x_ref, bias_ref, wqkv_ref, wo_ref, w1_ref, w2_ref, vecs_ref,
                         hw_ref, hb_ref, o_ref, *, nH, dh, inter, first):
    y = _layer_math(x_ref[...], bias_ref[0], wqkv_ref[...], wo_ref[...],
                    w1_ref[...], w2_ref[...], vecs_ref[...],
                    nH=nH, dh=dh, inter=inter, first=first)
    # torch.mean(sequence_output, 1): mean over S (incl. padded positions, as in ref)
    pooled = jnp.mean(y, axis=0, keepdims=True)               # (1, H) f32
    logits = (jnp.dot(pooled.astype(jnp.bfloat16), hw_ref[...],
                      preferred_element_type=jnp.float32) + hb_ref[...])
    b = pl.program_id(0)
    o_ref[pl.ds(b, 1), :] = logits.astype(o_ref.dtype)        # resident (B,128) block


# ------------------------- pallas_call wrappers -------------------------

def _weight_spec(shape):
    # Constant index_map: block is DMA'd once and reused for every batch grid step.
    # At roberta-base scale these could be single-buffered (pipeline_mode=pl.Buffered(1))
    # to keep the ~13.5 MiB of bf16 weights within v7x's 64 MiB VMEM.
    return pl.BlockSpec(shape, lambda b: (0,) * len(shape))


def _pack_layer_vecs(layer, emb_ln_g, emb_ln_b, *, H, inter):
    """Pack the 8 per-layer bias/LN vectors (+ embedding-LN pair for layer 0) into a
    single (10, P) f32 slab: one DMA instead of 8-10 tiny (8,128)-padded buffers."""
    P = max(3 * H, inter)

    def row(v):
        v = v.astype(jnp.float32)
        return jnp.pad(v, (0, P - v.shape[0]))

    zero = jnp.zeros((P,), jnp.float32)
    return jnp.stack([
        row(layer["bqkv"]), row(layer["b1"]), row(layer["bo"]),
        row(layer["attn_ln_g"]), row(layer["attn_ln_b"]),
        row(layer["b2"]), row(layer["ffn_ln_g"]), row(layer["ffn_ln_b"]),
        row(emb_ln_g) if emb_ln_g is not None else zero,
        row(emb_ln_b) if emb_ln_b is not None else zero,
    ])


def encoder_layer(x, bias, layer, vecs, *, B, S, H, nH, first):
    dh = H // nH
    inter = layer["w1"].shape[1]
    kernel = functools.partial(_encoder_layer_kernel, nH=nH, dh=dh, inter=inter,
                               first=first)
    return pl.pallas_call(
        kernel,
        out_shape=jax.ShapeDtypeStruct((B * S, H), jnp.bfloat16),
        grid=(B,),
        in_specs=[
            pl.BlockSpec((S, H), lambda b: (b, 0)),        # x (one batch element, bf16)
            pl.BlockSpec((1, 1, S), lambda b: (b, 0, 0)),  # additive attention bias
            _weight_spec((H, 3 * H)),                      # wqkv (bf16, Q pre-scaled)
            _weight_spec((H, H)),                          # wo (bf16)
            _weight_spec((H, inter)),                      # w1 (bf16)
            _weight_spec((inter, H)),                      # w2 (bf16)
            _weight_spec(vecs.shape),                      # packed bias/LN slab (f32)
        ],
        out_specs=pl.BlockSpec((S, H), lambda b: (b, 0)),
        compiler_params=pltpu.CompilerParams(
            dimension_semantics=("parallel",),
            vmem_limit_bytes=VMEM_LIMIT_BYTES),
    )(x, bias, layer["wqkv"], layer["wo"], layer["w1"], layer["w2"], vecs)


def encoder_last_layer(x, bias, layer, vecs, out_w, out_b, *, B, S, H, nH, first):
    dh = H // nH
    inter = layer["w1"].shape[1]
    C = out_w.shape[1]
    hw = jnp.pad(out_w, ((0, 0), (0, HEAD_PAD - C)))                      # (H, 128) bf16
    hb = jnp.pad(out_b, (0, HEAD_PAD - C)).astype(jnp.float32).reshape(1, HEAD_PAD)
    kernel = functools.partial(_encoder_last_kernel, nH=nH, dh=dh, inter=inter,
                               first=first)
    return pl.pallas_call(
        kernel,
        out_shape=jax.ShapeDtypeStruct((B, HEAD_PAD), jnp.float32),
        grid=(B,),
        in_specs=[
            pl.BlockSpec((S, H), lambda b: (b, 0)),
            pl.BlockSpec((1, 1, S), lambda b: (b, 0, 0)),
            _weight_spec((H, 3 * H)),
            _weight_spec((H, H)),
            _weight_spec((H, inter)),
            _weight_spec((inter, H)),
            _weight_spec(vecs.shape),
            _weight_spec((H, HEAD_PAD)),                   # classifier weight (bf16)
            _weight_spec((1, HEAD_PAD)),                   # classifier bias (f32)
        ],
        # The logits block is the full (B, 128) array, revisited on every grid step
        # (each step writes one row) -> the batch axis must be "arbitrary".
        out_specs=pl.BlockSpec((B, HEAD_PAD), lambda b: (0, 0)),
        compiler_params=pltpu.CompilerParams(
            dimension_semantics=("arbitrary",),
            vmem_limit_bytes=VMEM_LIMIT_BYTES),
    )(x, bias, layer["wqkv"], layer["wo"], layer["w1"], layer["w2"], vecs, hw, hb)


# ------------------------- model -------------------------

def init_params(key, *, vocab=100, max_pos=40, type_vocab=2, hidden=32,
                intermediate=64, num_layers=2, num_heads=4):
    # Synthetic deterministic weights (the real module loads pretrained roberta-base).
    def nrm(k, shape):
        return 0.02 * jax.random.normal(k, shape, jnp.float32)

    dh = hidden // num_heads
    qk_scale = 1.0 / (dh ** 0.5)

    keys = iter(jax.random.split(key, 8 + num_layers * 8))
    params = dict(
        word_emb=nrm(next(keys), (vocab, hidden)),
        pos_emb=nrm(next(keys), (max_pos, hidden)),
        type_emb=nrm(next(keys), (type_vocab, hidden)),
        emb_ln_g=jnp.ones((hidden,), jnp.float32),
        emb_ln_b=jnp.zeros((hidden,), jnp.float32),
        out_w=nrm(next(keys), (hidden, NUM_CLASSES)).astype(jnp.bfloat16),
        out_b=jnp.zeros((NUM_CLASSES,), jnp.float32),
        layers=[],
    )
    for _ in range(num_layers):
        wqkv = nrm(next(keys), (hidden, 3 * hidden))
        bqkv = jnp.zeros((3 * hidden,), jnp.float32)
        # Fold the attention 1/sqrt(dh) scale into the Q projection (weights AND bias)
        # at parameter-prep time so the kernel never scales the (S, S) score tiles.
        wqkv = wqkv.at[:, :hidden].multiply(qk_scale)
        bqkv = bqkv.at[:hidden].multiply(qk_scale)
        params["layers"].append(dict(
            wqkv=wqkv.astype(jnp.bfloat16),
            bqkv=bqkv,
            wo=nrm(next(keys), (hidden, hidden)).astype(jnp.bfloat16),
            bo=jnp.zeros((hidden,), jnp.float32),
            attn_ln_g=jnp.ones((hidden,), jnp.float32),
            attn_ln_b=jnp.zeros((hidden,), jnp.float32),
            w1=nrm(next(keys), (hidden, intermediate)).astype(jnp.bfloat16),
            b1=jnp.zeros((intermediate,), jnp.float32),
            w2=nrm(next(keys), (intermediate, hidden)).astype(jnp.bfloat16),
            b2=jnp.zeros((hidden,), jnp.float32),
            ffn_ln_g=jnp.ones((hidden,), jnp.float32),
            ffn_ln_b=jnp.zeros((hidden,), jnp.float32),
        ))
    return params


def toxic_model_forward(params, input_ids, attention_mask, token_type_ids, *,
                        num_heads):
    B, S = input_ids.shape
    H = params["word_emb"].shape[1]
    inter = params["layers"][0]["w1"].shape[1]

    # --- embeddings (gathers stay in plain JAX; embedding LN is folded into layer 0) ---
    padding_idx = 1  # roberta convention: positions offset by padding_idx
    mask_i = attention_mask.astype(jnp.int32)
    position_ids = jnp.cumsum(mask_i, axis=1) * mask_i + padding_idx
    emb = (params["word_emb"][input_ids]
           + params["pos_emb"][position_ids]
           + params["type_emb"][token_type_ids])
    x = emb.reshape(B * S, H).astype(jnp.bfloat16)   # bf16 activations between kernels

    # additive attention-mask bias (f32 for the softmax), shape (B, 1, S)
    bias = ((1.0 - attention_mask.astype(jnp.float32)) * -1e9).reshape(B, 1, S)

    # TODO(synk): for real sequence lengths (S>=256) tile the query rows via a
    # (B, q_tiles) grid instead of whole-S blocks per batch element.
    n_layers = len(params["layers"])
    logits = None
    for li, layer in enumerate(params["layers"]):
        first = li == 0
        last = li == n_layers - 1
        vecs = _pack_layer_vecs(layer,
                                params["emb_ln_g"] if first else None,
                                params["emb_ln_b"] if first else None,
                                H=H, inter=inter)
        if last:
            # dropout / dropout1..5 are identity at inference and all 5 logits share
            # the same Linear -> (l1+..+l5)/5 == output(mean(seq_out, 1)); the pool +
            # classifier are fused into this last layer's kernel.
            logits = encoder_last_layer(x, bias, layer, vecs,
                                        params["out_w"], params["out_b"],
                                        B=B, S=S, H=H, nH=num_heads, first=first)
        else:
            x = encoder_layer(x, bias, layer, vecs,
                              B=B, S=S, H=H, nH=num_heads, first=first)
    return logits[:, :NUM_CLASSES]


if __name__ == "__main__":
    key = jax.random.PRNGKey(0)
    pkey, ikey = jax.random.split(key)

    B, S, NUM_HEADS = 2, 8, 4
    params = init_params(pkey, num_heads=NUM_HEADS)

    input_ids = jax.random.randint(ikey, (B, S), 2, 100, dtype=jnp.int32)
    attention_mask = jnp.array(
        [[1, 1, 1, 1, 1, 1, 1, 1],
         [1, 1, 1, 1, 1, 1, 0, 0]], dtype=jnp.int32)
    token_type_ids = jnp.zeros((B, S), dtype=jnp.int32)

    # num_heads is a static model hyper-parameter, NOT a traced argument.
    fwd = jax.jit(functools.partial(toxic_model_forward, num_heads=NUM_HEADS))
    logits = fwd(params, input_ids, attention_mask, token_type_ids)
    jax.block_until_ready(logits)
    assert logits.shape == (B, NUM_CLASSES) and logits.dtype == jnp.float32
    print("KERNEL_OK")
</pallas_src>

<mosaic_0001>
module attributes {stable_mosaic.version = 11 : i64} {
  func.func @_encoder_layer_kernel(%arg0: i32, %arg1: memref<8x32xbf16, #tpu.memory_space<vmem>>, %arg2: memref<1x1x8xf32, #tpu.memory_space<vmem>>, %arg3: memref<32x96xbf16, #tpu.memory_space<vmem>>, %arg4: memref<32x32xbf16, #tpu.memory_space<vmem>>, %arg5: memref<32x64xbf16, #tpu.memory_space<vmem>>, %arg6: memref<64x32xbf16, #tpu.memory_space<vmem>>, %arg7: memref<10x96xf32, #tpu.memory_space<vmem>>, %arg8: memref<8x32xbf16, #tpu.memory_space<vmem>>) attributes {dimension_semantics = [#tpu.dimension_semantics<parallel>], iteration_bounds = array<i64: 2>, scalar_prefetch = 0 : i64, scratch_operands = 0 : i64, tpu.core_type = #tpu.core_type<tc>, window_params = [{transform_indices = @transform_0, window_bounds = array<i64: 8, 32>}, {transform_indices = @transform_1, window_bounds = array<i64: 1, 1, 8>}, {pipeline_mode = #tpu.pipeline_mode<synchronous>, transform_indices = @transform_2, window_bounds = array<i64: 32, 96>}, {pipeline_mode = #tpu.pipeline_mode<synchronous>, transform_indices = @transform_3, window_bounds = array<i64: 32, 32>}, {pipeline_mode = #tpu.pipeline_mode<synchronous>, transform_indices = @transform_4, window_bounds = array<i64: 32, 64>}, {pipeline_mode = #tpu.pipeline_mode<synchronous>, transform_indices = @transform_5, window_bounds = array<i64: 64, 32>}, {pipeline_mode = #tpu.pipeline_mode<synchronous>, transform_indices = @transform_6, window_bounds = array<i64: 10, 96>}, {transform_indices = @transform_7, window_bounds = array<i64: 8, 32>}]} {
    %c0 = arith.constant 0 : index
    %c0_0 = arith.constant 0 : index
    %0 = vector.load %arg1[%c0, %c0_0] : memref<8x32xbf16, #tpu.memory_space<vmem>>, vector<8x32xbf16>
    %c0_1 = arith.constant 0 : index
    %c0_2 = arith.constant 0 : index
    %c0_3 = arith.constant 0 : index
    %1 = vector.load %arg2[%c0_1, %c0_2, %c0_3] : memref<1x1x8xf32, #tpu.memory_space<vmem>>, vector<1x1x8xf32>
    %2 = vector.shape_cast %1 : vector<1x1x8xf32> to vector<1x8xf32>
    %c0_4 = arith.constant 0 : index
    %c0_5 = arith.constant 0 : index
    %3 = vector.load %arg3[%c0_4, %c0_5] : memref<32x96xbf16, #tpu.memory_space<vmem>>, vector<32x96xbf16>
    %c0_6 = arith.constant 0 : index
    %c0_7 = arith.constant 0 : index
    %4 = vector.load %arg4[%c0_6, %c0_7] : memref<32x32xbf16, #tpu.memory_space<vmem>>, vector<32x32xbf16>
    %c0_8 = arith.constant 0 : index
    %c0_9 = arith.constant 0 : index
    %5 = vector.load %arg5[%c0_8, %c0_9] : memref<32x64xbf16, #tpu.memory_space<vmem>>, vector<32x64xbf16>
    %c0_10 = arith.constant 0 : index
    %c0_11 = arith.constant 0 : index
    %6 = vector.load %arg6[%c0_10, %c0_11] : memref<64x32xbf16, #tpu.memory_space<vmem>>, vector<64x32xbf16>
    %c0_12 = arith.constant 0 : index
    %c0_13 = arith.constant 0 : index
    %7 = vector.load %arg7[%c0_12, %c0_13] : memref<10x96xf32, #tpu.memory_space<vmem>>, vector<10x96xf32>
    %8 = vector.extract_strided_slice %7 {offsets = [0, 0], sizes = [1, 96], strides = [1, 1]} : vector<10x96xf32> to vector<1x96xf32>
    %9 = vector.extract_strided_slice %7 {offsets = [1, 0], sizes = [1, 64], strides = [1, 1]} : vector<10x96xf32> to vector<1x64xf32>
    %10 = vector.extract_strided_slice %7 {offsets = [2, 0], sizes = [1, 32], strides = [1, 1]} : vector<10x96xf32> to vector<1x32xf32>
    %11 = vector.extract_strided_slice %7 {offsets = [3, 0], sizes = [1, 32], strides = [1, 1]} : vector<10x96xf32> to vector<1x32xf32>
    %12 = vector.extract_strided_slice %7 {offsets = [4, 0], sizes = [1, 32], strides = [1, 1]} : vector<10x96xf32> to vector<1x32xf32>
    %13 = vector.extract_strided_slice %7 {offsets = [5, 0], sizes = [1, 32], strides = [1, 1]} : vector<10x96xf32> to vector<1x32xf32>
    %14 = vector.extract_strided_slice %7 {offsets = [6, 0], sizes = [1, 32], strides = [1, 1]} : vector<10x96xf32> to vector<1x32xf32>
    %15 = vector.extract_strided_slice %7 {offsets = [7, 0], sizes = [1, 32], strides = [1, 1]} : vector<10x96xf32> to vector<1x32xf32>
    %16 = arith.extf %0 : vector<8x32xbf16> to vector<8x32xf32>
    %17 = vector.extract_strided_slice %7 {offsets = [8, 0], sizes = [1, 32], strides = [1, 1]} : vector<10x96xf32> to vector<1x32xf32>
    %18 = vector.extract_strided_slice %7 {offsets = [9, 0], sizes = [1, 32], strides = [1, 1]} : vector<10x96xf32> to vector<1x32xf32>
    %cst = arith.constant dense<0.000000e+00> : vector<8xf32>
    %19 = vector.multi_reduction <add>, %16, %cst [1] : vector<8x32xf32> to vector<8xf32>
    %20 = vector.shape_cast %19 : vector<8xf32> to vector<8x1xf32>
    %cst_14 = arith.constant 3.200000e+01 : f32
    %21 = vector.broadcast %cst_14 : f32 to vector<8x1xf32>
    %22 = arith.divf %20, %21 : vector<8x1xf32>
    %23 = vector.broadcast %22 : vector<8x1xf32> to vector<8x32xf32>
    %24 = arith.subf %16, %23 : vector<8x32xf32>
    %25 = arith.mulf %24, %24 : vector<8x32xf32>
    %cst_15 = arith.constant dense<0.000000e+00> : vector<8xf32>
    %26 = vector.multi_reduction <add>, %25, %cst_15 [1] : vector<8x32xf32> to vector<8xf32>
    %27 = vector.shape_cast %26 : vector<8xf32> to vector<8x1xf32>
    %cst_16 = arith.constant 3.200000e+01 : f32
    %28 = vector.broadcast %cst_16 : f32 to vector<8x1xf32>
    %29 = arith.divf %27, %28 : vector<8x1xf32>
    %30 = vector.broadcast %22 : vector<8x1xf32> to vector<8x32xf32>
    %31 = arith.subf %16, %30 : vector<8x32xf32>
    %cst_17 = arith.constant 1.000000e-07 : f32
    %32 = vector.broadcast %cst_17 : f32 to vector<8x1xf32>
    %33 = arith.addf %29, %32 : vector<8x1xf32>
    %34 = math.rsqrt %33 : vector<8x1xf32>
    %35 = vector.broadcast %34 : vector<8x1xf32> to vector<8x32xf32>
    %36 = arith.mulf %31, %35 : vector<8x32xf32>
    %37 = vector.broadcast %17 : vector<1x32xf32> to vector<8x32xf32>
    %38 = arith.mulf %36, %37 : vector<8x32xf32>
    %39 = vector.broadcast %18 : vector<1x32xf32> to vector<8x32xf32>
    %40 = arith.addf %38, %39 : vector<8x32xf32>
    %41 = arith.truncf %40 : vector<8x32xf32> to vector<8x32xbf16>
    %cst_18 = arith.constant dense<0.000000e+00> : vector<8x96xf32>
    %42 = tpu.matmul %41, %3, %cst_18 {dimension_numbers = #tpu.dot_dimension_numbers<[1], [0], [0], [1], [0, 0, 1, 1], [], []>} : vector<8x32xbf16>, vector<32x96xbf16>, vector<8x96xf32> -> vector<8x96xf32>
    %43 = vector.broadcast %8 : vector<1x96xf32> to vector<8x96xf32>
    %44 = arith.addf %42, %43 : vector<8x96xf32>
    %45 = vector.extract_strided_slice %44 {offsets = [0, 0], sizes = [8, 8], strides = [1, 1]} : vector<8x96xf32> to vector<8x8xf32>
    %46 = arith.truncf %45 : vector<8x8xf32> to vector<8x8xbf16>
    %47 = vector.extract_strided_slice %44 {offsets = [0, 32], sizes = [8, 8], strides = [1, 1]} : vector<8x96xf32> to vector<8x8xf32>
    %48 = arith.truncf %47 : vector<8x8xf32> to vector<8x8xbf16>
    %49 = vector.extract_strided_slice %44 {offsets = [0, 64], sizes = [8, 8], strides = [1, 1]} : vector<8x96xf32> to vector<8x8xf32>
    %50 = arith.truncf %49 : vector<8x8xf32> to vector<8x8xbf16>
    %cst_19 = arith.constant dense<0.000000e+00> : vector<8x8xf32>
    %51 = tpu.matmul %46, %48, %cst_19 {dimension_numbers = #tpu.dot_dimension_numbers<[1], [1], [0], [0], [0, 0, 1, 0], [], []>} : vector<8x8xbf16>, vector<8x8xbf16>, vector<8x8xf32> -> vector<8x8xf32>
    %52 = vector.broadcast %2 : vector<1x8xf32> to vector<8x8xf32>
    %53 = arith.addf %51, %52 : vector<8x8xf32>
    %cst_20 = arith.constant dense<0xFF800000> : vector<8xf32>
    %54 = vector.multi_reduction <maximumf>, %53, %cst_20 [1] : vector<8x8xf32> to vector<8xf32>
    %55 = vector.shape_cast %54 : vector<8xf32> to vector<8x1xf32>
    %56 = vector.broadcast %55 : vector<8x1xf32> to vector<8x8xf32>
    %57 = arith.subf %53, %56 : vector<8x8xf32>
    %58 = math.exp %57 : vector<8x8xf32>
    %cst_21 = arith.constant dense<0.000000e+00> : vector<8xf32>
    %59 = vector.multi_reduction <add>, %58, %cst_21 [1] : vector<8x8xf32> to vector<8xf32>
    %60 = vector.shape_cast %59 : vector<8xf32> to vector<8x1xf32>
    %61 = arith.truncf %58 : vector<8x8xf32> to vector<8x8xbf16>
    %cst_22 = arith.constant dense<0.000000e+00> : vector<8x8xf32>
    %62 = tpu.matmul %61, %50, %cst_22 {dimension_numbers = #tpu.dot_dimension_numbers<[1], [0], [0], [1], [0, 0, 1, 1], [], []>} : vector<8x8xbf16>, vector<8x8xbf16>, vector<8x8xf32> -> vector<8x8xf32>
    %63 = tpu.reciprocal %60 {approx = true} : vector<8x1xf32> -> vector<8x1xf32>
    %64 = vector.broadcast %63 : vector<8x1xf32> to vector<8x8xf32>
    %65 = arith.mulf %62, %64 : vector<8x8xf32>
    %66 = vector.extract_strided_slice %44 {offsets = [0, 8], sizes = [8, 8], strides = [1, 1]} : vector<8x96xf32> to vector<8x8xf32>
    %67 = arith.truncf %66 : vector<8x8xf32> to vector<8x8xbf16>
    %68 = vector.extract_strided_slice %44 {offsets = [0, 40], sizes = [8, 8], strides = [1, 1]} : vector<8x96xf32> to vector<8x8xf32>
    %69 = arith.truncf %68 : vector<8x8xf32> to vector<8x8xbf16>
    %70 = vector.extract_strided_slice %44 {offsets = [0, 72], sizes = [8, 8], strides = [1, 1]} : vector<8x96xf32> to vector<8x8xf32>
    %71 = arith.truncf %70 : vector<8x8xf32> to vector<8x8xbf16>
    %cst_23 = arith.constant dense<0.000000e+00> : vector<8x8xf32>
    %72 = tpu.matmul %67, %69, %cst_23 {dimension_numbers = #tpu.dot_dimension_numbers<[1], [1], [0], [0], [0, 0, 1, 0], [], []>} : vector<8x8xbf16>, vector<8x8xbf16>, vector<8x8xf32> -> vector<8x8xf32>
    %73 = vector.broadcast %2 : vector<1x8xf32> to vector<8x8xf32>
    %74 = arith.addf %72, %73 : vector<8x8xf32>
    %cst_24 = arith.constant dense<0xFF800000> : vector<8xf32>
    %75 = vector.multi_reduction <maximumf>, %74, %cst_24 [1] : vector<8x8xf32> to vector<8xf32>
    %76 = vector.shape_cast %75 : vector<8xf32> to vector<8x1xf32>
    %77 = vector.broadcast %76 : vector<8x1xf32> to vector<8x8xf32>
    %78 = arith.subf %74, %77 : vector<8x8xf32>
    %79 = math.exp %78 : vector<8x8xf32>
    %cst_25 = arith.constant dense<0.000000e+00> : vector<8xf32>
    %80 = vector.multi_reduction <add>, %79, %cst_25 [1] : vector<8x8xf32> to vector<8xf32>
    %81 = vector.shape_cast %80 : vector<8xf32> to vector<8x1xf32>
    %82 = arith.truncf %79 : vector<8x8xf32> to vector<8x8xbf16>
    %cst_26 = arith.constant dense<0.000000e+00> : vector<8x8xf32>
    %83 = tpu.matmul %82, %71, %cst_26 {dimension_numbers = #tpu.dot_dimension_numbers<[1], [0], [0], [1], [0, 0, 1, 1], [], []>} : vector<8x8xbf16>, vector<8x8xbf16>, vector<8x8xf32> -> vector<8x8xf32>
    %84 = tpu.reciprocal %81 {approx = true} : vector<8x1xf32> -> vector<8x1xf32>
    %85 = vector.broadcast %84 : vector<8x1xf32> to vector<8x8xf32>
    %86 = arith.mulf %83, %85 : vector<8x8xf32>
    %87 = vector.extract_strided_slice %44 {offsets = [0, 16], sizes = [8, 8], strides = [1, 1]} : vector<8x96xf32> to vector<8x8xf32>
    %88 = arith.truncf %87 : vector<8x8xf32> to vector<8x8xbf16>
    %89 = vector.extract_strided_slice %44 {offsets = [0, 48], sizes = [8, 8], strides = [1, 1]} : vector<8x96xf32> to vector<8x8xf32>
    %90 = arith.truncf %89 : vector<8x8xf32> to vector<8x8xbf16>
    %91 = vector.extract_strided_slice %44 {offsets = [0, 80], sizes = [8, 8], strides = [1, 1]} : vector<8x96xf32> to vector<8x8xf32>
    %92 = arith.truncf %91 : vector<8x8xf32> to vector<8x8xbf16>
    %cst_27 = arith.constant dense<0.000000e+00> : vector<8x8xf32>
    %93 = tpu.matmul %88, %90, %cst_27 {dimension_numbers = #tpu.dot_dimension_numbers<[1], [1], [0], [0], [0, 0, 1, 0], [], []>} : vector<8x8xbf16>, vector<8x8xbf16>, vector<8x8xf32> -> vector<8x8xf32>
    %94 = vector.broadcast %2 : vector<1x8xf32> to vector<8x8xf32>
    %95 = arith.addf %93, %94 : vector<8x8xf32>
    %cst_28 = arith.constant dense<0xFF800000> : vector<8xf32>
    %96 = vector.multi_reduction <maximumf>, %95, %cst_28 [1] : vector<8x8xf32> to vector<8xf32>
    %97 = vector.shape_cast %96 : vector<8xf32> to vector<8x1xf32>
    %98 = vector.broadcast %97 : vector<8x1xf32> to vector<8x8xf32>
    %99 = arith.subf %95, %98 : vector<8x8xf32>
    %100 = math.exp %99 : vector<8x8xf32>
    %cst_29 = arith.constant dense<0.000000e+00> : vector<8xf32>
    %101 = vector.multi_reduction <add>, %100, %cst_29 [1] : vector<8x8xf32> to vector<8xf32>
    %102 = vector.shape_cast %101 : vector<8xf32> to vector<8x1xf32>
    %103 = arith.truncf %100 : vector<8x8xf32> to vector<8x8xbf16>
    %cst_30 = arith.constant dense<0.000000e+00> : vector<8x8xf32>
    %104 = tpu.matmul %103, %92, %cst_30 {dimension_numbers = #tpu.dot_dimension_numbers<[1], [0], [0], [1], [0, 0, 1, 1], [], []>} : vector<8x8xbf16>, vector<8x8xbf16>, vector<8x8xf32> -> vector<8x8xf32>
    %105 = tpu.reciprocal %102 {approx = true} : vector<8x1xf32> -> vector<8x1xf32>
    %106 = vector.broadcast %105 : vector<8x1xf32> to vector<8x8xf32>
    %107 = arith.mulf %104, %106 : vector<8x8xf32>
    %108 = vector.extract_strided_slice %44 {offsets = [0, 24], sizes = [8, 8], strides = [1, 1]} : vector<8x96xf32> to vector<8x8xf32>
    %109 = arith.truncf %108 : vector<8x8xf32> to vector<8x8xbf16>
    %110 = vector.extract_strided_slice %44 {offsets = [0, 56], sizes = [8, 8], strides = [1, 1]} : vector<8x96xf32> to vector<8x8xf32>
    %111 = arith.truncf %110 : vector<8x8xf32> to vector<8x8xbf16>
    %112 = vector.extract_strided_slice %44 {offsets = [0, 88], sizes = [8, 8], strides = [1, 1]} : vector<8x96xf32> to vector<8x8xf32>
    %113 = arith.truncf %112 : vector<8x8xf32> to vector<8x8xbf16>
    %cst_31 = arith.constant dense<0.000000e+00> : vector<8x8xf32>
    %114 = tpu.matmul %109, %111, %cst_31 {dimension_numbers = #tpu.dot_dimension_numbers<[1], [1], [0], [0], [0, 0, 1, 0], [], []>} : vector<8x8xbf16>, vector<8x8xbf16>, vector<8x8xf32> -> vector<8x8xf32>
    %115 = vector.broadcast %2 : vector<1x8xf32> to vector<8x8xf32>
    %116 = arith.addf %114, %115 : vector<8x8xf32>
    %cst_32 = arith.constant dense<0xFF800000> : vector<8xf32>
    %117 = vector.multi_reduction <maximumf>, %116, %cst_32 [1] : vector<8x8xf32> to vector<8xf32>
    %118 = vector.shape_cast %117 : vector<8xf32> to vector<8x1xf32>
    %119 = vector.broadcast %118 : vector<8x1xf32> to vector<8x8xf32>
    %120 = arith.subf %116, %119 : vector<8x8xf32>
    %121 = math.exp %120 : vector<8x8xf32>
    %cst_33 = arith.constant dense<0.000000e+00> : vector<8xf32>
    %122 = vector.multi_reduction <add>, %121, %cst_33 [1] : vector<8x8xf32> to vector<8xf32>
    %123 = vector.shape_cast %122 : vector<8xf32> to vector<8x1xf32>
    %124 = arith.truncf %121 : vector<8x8xf32> to vector<8x8xbf16>
    %cst_34 = arith.constant dense<0.000000e+00> : vector<8x8xf32>
    %125 = tpu.matmul %124, %113, %cst_34 {dimension_numbers = #tpu.dot_dimension_numbers<[1], [0], [0], [1], [0, 0, 1, 1], [], []>} : vector<8x8xbf16>, vector<8x8xbf16>, vector<8x8xf32> -> vector<8x8xf32>
    %126 = tpu.reciprocal %123 {approx = true} : vector<8x1xf32> -> vector<8x1xf32>
    %127 = vector.broadcast %126 : vector<8x1xf32> to vector<8x8xf32>
    %128 = arith.mulf %125, %127 : vector<8x8xf32>
    %129 = tpu.concatenate %65, %86, %107, %128 in 1 : vector<8x8xf32>, vector<8x8xf32>, vector<8x8xf32>, vector<8x8xf32> -> vector<8x32xf32>
    %130 = arith.truncf %129 : vector<8x32xf32> to vector<8x32xbf16>
    %cst_35 = arith.constant dense<0.000000e+00> : vector<8x32xf32>
    %131 = tpu.matmul %130, %4, %cst_35 {dimension_numbers = #tpu.dot_dimension_numbers<[1], [0], [0], [1], [0, 0, 1, 1], [], []>} : vector<8x32xbf16>, vector<32x32xbf16>, vector<8x32xf32> -> vector<8x32xf32>
    %132 = vector.broadcast %10 : vector<1x32xf32> to vector<8x32xf32>
    %133 = arith.addf %131, %132 : vector<8x32xf32>
    %134 = arith.addf %40, %133 : vector<8x32xf32>
    %cst_36 = arith.constant dense<0.000000e+00> : vector<8xf32>
    %135 = vector.multi_reduction <add>, %134, %cst_36 [1] : vector<8x32xf32> to vector<8xf32>
    %136 = vector.shape_cast %135 : vector<8xf32> to vector<8x1xf32>
    %cst_37 = arith.constant 3.200000e+01 : f32
    %137 = vector.broadcast %cst_37 : f32 to vector<8x1xf32>
    %138 = arith.divf %136, %137 : vector<8x1xf32>
    %139 = vector.broadcast %138 : vector<8x1xf32> to vector<8x32xf32>
    %140 = arith.subf %134, %139 : vector<8x32xf32>
    %141 = arith.mulf %140, %140 : vector<8x32xf32>
    %cst_38 = arith.constant dense<0.000000e+00> : vector<8xf32>
    %142 = vector.multi_reduction <add>, %141, %cst_38 [1] : vector<8x32xf32> to vector<8xf32>
    %143 = vector.shape_cast %142 : vector<8xf32> to vector<8x1xf32>
    %cst_39 = arith.constant 3.200000e+01 : f32
    %144 = vector.broadcast %cst_39 : f32 to vector<8x1xf32>
    %145 = arith.divf %143, %144 : vector<8x1xf32>
    %146 = vector.broadcast %138 : vector<8x1xf32> to vector<8x32xf32>
    %147 = arith.subf %134, %146 : vector<8x32xf32>
    %cst_40 = arith.constant 1.000000e-07 : f32
    %148 = vector.broadcast %cst_40 : f32 to vector<8x1xf32>
    %149 = arith.addf %145, %148 : vector<8x1xf32>
    %150 = math.rsqrt %149 : vector<8x1xf32>
    %151 = vector.broadcast %150 : vector<8x1xf32> to vector<8x32xf32>
    %152 = arith.mulf %147, %151 : vector<8x32xf32>
    %153 = vector.broadcast %11 : vector<1x32xf32> to vector<8x32xf32>
    %154 = arith.mulf %152, %153 : vector<8x32xf32>
    %155 = vector.broadcast %12 : vector<1x32xf32> to vector<8x32xf32>
    %156 = arith.addf %154, %155 : vector<8x32xf32>
    %157 = arith.truncf %156 : vector<8x32xf32> to vector<8x32xbf16>
    %cst_41 = arith.constant dense<0.000000e+00> : vector<8x64xf32>
    %158 = tpu.matmul %157, %5, %cst_41 {dimension_numbers = #tpu.dot_dimension_numbers<[1], [0], [0], [1], [0, 0, 1, 1], [], []>} : vector<8x32xbf16>, vector<32x64xbf16>, vector<8x64xf32> -> vector<8x64xf32>
    %159 = vector.broadcast %9 : vector<1x64xf32> to vector<8x64xf32>
    %160 = arith.addf %158, %159 : vector<8x64xf32>
    %cst_42 = arith.constant 5.000000e-01 : f32
    %161 = vector.broadcast %cst_42 : f32 to vector<8x64xf32>
    %162 = arith.mulf %161, %160 : vector<8x64xf32>
    %cst_43 = arith.constant 0.707106769 : f32
    %163 = vector.broadcast %cst_43 : f32 to vector<8x64xf32>
    %164 = arith.mulf %160, %163 : vector<8x64xf32>
    %165 = math.absf %164 : vector<8x64xf32>
    %cst_44 = arith.constant 0.327591091 : f32
    %166 = vector.broadcast %cst_44 : f32 to vector<8x64xf32>
    %167 = arith.mulf %166, %165 : vector<8x64xf32>
    %cst_45 = arith.constant 1.000000e+00 : f32
    %168 = vector.broadcast %cst_45 : f32 to vector<8x64xf32>
    %169 = arith.addf %168, %167 : vector<8x64xf32>
    %cst_46 = arith.constant 1.000000e+00 : f32
    %170 = vector.broadcast %cst_46 : f32 to vector<8x64xf32>
    %171 = arith.divf %170, %169 : vector<8x64xf32>
    %cst_47 = arith.constant 1.06140542 : f32
    %172 = vector.broadcast %cst_47 : f32 to vector<8x64xf32>
    %173 = arith.mulf %172, %171 : vector<8x64xf32>
    %cst_48 = arith.constant 1.45315206 : f32
    %174 = vector.broadcast %cst_48 : f32 to vector<8x64xf32>
    %175 = arith.subf %173, %174 : vector<8x64xf32>
    %176 = arith.mulf %175, %171 : vector<8x64xf32>
    %cst_49 = arith.constant 1.42141378 : f32
    %177 = vector.broadcast %cst_49 : f32 to vector<8x64xf32>
    %178 = arith.addf %176, %177 : vector<8x64xf32>
    %179 = arith.mulf %178, %171 : vector<8x64xf32>
    %cst_50 = arith.constant 0.284496725 : f32
    %180 = vector.broadcast %cst_50 : f32 to vector<8x64xf32>
    %181 = arith.subf %179, %180 : vector<8x64xf32>
    %182 = arith.mulf %181, %171 : vector<8x64xf32>
    %cst_51 = arith.constant 0.254829586 : f32
    %183 = vector.broadcast %cst_51 : f32 to vector<8x64xf32>
    %184 = arith.addf %182, %183 : vector<8x64xf32>
    %185 = arith.mulf %184, %171 : vector<8x64xf32>
    %cst_52 = arith.constant 0.000000e+00 : f32
    %186 = vector.broadcast %cst_52 : f32 to vector<8x64xf32>
    %187 = arith.subf %186, %165 : vector<8x64xf32>
    %188 = arith.mulf %187, %165 : vector<8x64xf32>
    %189 = math.exp %188 : vector<8x64xf32>
    %190 = arith.mulf %185, %189 : vector<8x64xf32>
    %cst_53 = arith.constant 1.000000e+00 : f32
    %191 = vector.broadcast %cst_53 : f32 to vector<8x64xf32>
    %192 = arith.subf %191, %190 : vector<8x64xf32>
    %cst_54 = arith.constant 0.000000e+00 : f32
    %193 = vector.broadcast %cst_54 : f32 to vector<8x64xf32>
    %194 = arith.cmpf olt, %164, %193 : vector<8x64xf32>
    %cst_55 = arith.constant 0.000000e+00 : f32
    %195 = vector.broadcast %cst_55 : f32 to vector<8x64xf32>
    %196 = arith.subf %195, %192 : vector<8x64xf32>
    %197 = arith.select %194, %196, %192 : vector<8x64xi1>, vector<8x64xf32>
    %cst_56 = arith.constant 1.000000e+00 : f32
    %198 = vector.broadcast %cst_56 : f32 to vector<8x64xf32>
    %199 = arith.addf %198, %197 : vector<8x64xf32>
    %200 = arith.mulf %162, %199 : vector<8x64xf32>
    %201 = arith.truncf %200 : vector<8x64xf32> to vector<8x64xbf16>
    %cst_57 = arith.constant dense<0.000000e+00> : vector<8x32xf32>
    %202 = tpu.matmul %201, %6, %cst_57 {dimension_numbers = #tpu.dot_dimension_numbers<[1], [0], [0], [1], [0, 0, 1, 1], [], []>} : vector<8x64xbf16>, vector<64x32xbf16>, vector<8x32xf32> -> vector<8x32xf32>
    %203 = vector.broadcast %13 : vector<1x32xf32> to vector<8x32xf32>
    %204 = arith.addf %202, %203 : vector<8x32xf32>
    %205 = arith.addf %156, %204 : vector<8x32xf32>
    %cst_58 = arith.constant dense<0.000000e+00> : vector<8xf32>
    %206 = vector.multi_reduction <add>, %205, %cst_58 [1] : vector<8x32xf32> to vector<8xf32>
    %207 = vector.shape_cast %206 : vector<8xf32> to vector<8x1xf32>
    %cst_59 = arith.constant 3.200000e+01 : f32
    %208 = vector.broadcast %cst_59 : f32 to vector<8x1xf32>
    %209 = arith.divf %207, %208 : vector<8x1xf32>
    %210 = vector.broadcast %209 : vector<8x1xf32> to vector<8x32xf32>
    %211 = arith.subf %205, %210 : vector<8x32xf32>
    %212 = arith.mulf %211, %211 : vector<8x32xf32>
    %cst_60 = arith.constant dense<0.000000e+00> : vector<8xf32>
    %213 = vector.multi_reduction <add>, %212, %cst_60 [1] : vector<8x32xf32> to vector<8xf32>
    %214 = vector.shape_cast %213 : vector<8xf32> to vector<8x1xf32>
    %cst_61 = arith.constant 3.200000e+01 : f32
    %215 = vector.broadcast %cst_61 : f32 to vector<8x1xf32>
    %216 = arith.divf %214, %215 : vector<8x1xf32>
    %217 = vector.broadcast %209 : vector<8x1xf32> to vector<8x32xf32>
    %218 = arith.subf %205, %217 : vector<8x32xf32>
    %cst_62 = arith.constant 1.000000e-07 : f32
    %219 = vector.broadcast %cst_62 : f32 to vector<8x1xf32>
    %220 = arith.addf %216, %219 : vector<8x1xf32>
    %221 = math.rsqrt %220 : vector<8x1xf32>
    %222 = vector.broadcast %221 : vector<8x1xf32> to vector<8x32xf32>
    %223 = arith.mulf %218, %222 : vector<8x32xf32>
    %224 = vector.broadcast %14 : vector<1x32xf32> to vector<8x32xf32>
    %225 = arith.mulf %223, %224 : vector<8x32xf32>
    %226 = vector.broadcast %15 : vector<1x32xf32> to vector<8x32xf32>
    %227 = arith.addf %225, %226 : vector<8x32xf32>
    %228 = arith.truncf %227 : vector<8x32xf32> to vector<8x32xbf16>
    %c0_63 = arith.constant 0 : index
    %c0_64 = arith.constant 0 : index
    %229 = vector.load %arg8[%c0_63, %c0_64] : memref<8x32xbf16, #tpu.memory_space<vmem>>, vector<8x32xbf16>
    tpu.vector_store %arg8[%c0_63, %c0_64], %228 {strides = array<i32>} : memref<8x32xbf16, #tpu.memory_space<vmem>>, vector<8x32xbf16>,
    return
  }
  func.func @transform_0(%arg0: i32) -> (i32, i32) {
    %c0_i32 = arith.constant 0 : i32
    %c0_i32_0 = arith.constant 0 : i32
    return %arg0, %c0_i32 : i32, i32
  }
  func.func @transform_1(%arg0: i32) -> (i32, i32, i32) {
    %c0_i32 = arith.constant 0 : i32
    %c0_i32_0 = arith.constant 0 : i32
    %c0_i32_1 = arith.constant 0 : i32
    return %arg0, %c0_i32, %c0_i32_0 : i32, i32, i32
  }
  func.func @transform_2(%arg0: i32) -> (i32, i32) {
    %c0_i32 = arith.constant 0 : i32
    %c0_i32_0 = arith.constant 0 : i32
    %c0_i32_1 = arith.constant 0 : i32
    return %c0_i32, %c0_i32_0 : i32, i32
  }
  func.func @transform_3(%arg0: i32) -> (i32, i32) {
    %c0_i32 = arith.constant 0 : i32
    %c0_i32_0 = arith.constant 0 : i32
    %c0_i32_1 = arith.constant 0 : i32
    return %c0_i32, %c0_i32_0 : i32, i32
  }
  func.func @transform_4(%arg0: i32) -> (i32, i32) {
    %c0_i32 = arith.constant 0 : i32
    %c0_i32_0 = arith.constant 0 : i32
    %c0_i32_1 = arith.constant 0 : i32
    return %c0_i32, %c0_i32_0 : i32, i32
  }
  func.func @transform_5(%arg0: i32) -> (i32, i32) {
    %c0_i32 = arith.constant 0 : i32
    %c0_i32_0 = arith.constant 0 : i32
    %c0_i32_1 = arith.constant 0 : i32
    return %c0_i32, %c0_i32_0 : i32, i32
  }
  func.func @transform_6(%arg0: i32) -> (i32, i32) {
    %c0_i32 = arith.constant 0 : i32
    %c0_i32_0 = arith.constant 0 : i32
    %c0_i32_1 = arith.constant 0 : i32
    return %c0_i32, %c0_i32_0 : i32, i32
  }
  func.func @transform_7(%arg0: i32) -> (i32, i32) {
    %c0_i32 = arith.constant 0 : i32
    %c0_i32_0 = arith.constant 0 : i32
    return %arg0, %c0_i32 : i32, i32
  }
}

module attributes {stable_mosaic.version = 11 : i64} {
  func.func @_encoder_last_kernel(%arg0: i32, %arg1: memref<8x32xbf16, #tpu.memory_space<vmem>>, %arg2: memref<1x1x8xf32, #tpu.memory_space<vmem>>, %arg3: memref<32x96xbf16, #tpu.memory_space<vmem>>, %arg4: memref<32x32xbf16, #tpu.memory_space<vmem>>, %arg5: memref<32x64xbf16, #tpu.memory_space<vmem>>, %arg6: memref<64x32xbf16, #tpu.memory_space<vmem>>, %arg7: memref<10x96xf32, #tpu.memory_space<vmem>>, %arg8: memref<32x128xbf16, #tpu.memory_space<vmem>>, %arg9: memref<1x128xf32, #tpu.memory_space<vmem>>, %arg10: memref<2x128xf32, #tpu.memory_space<vmem>>) attributes {dimension_semantics = [#tpu.dimension_semantics<arbitrary>], iteration_bounds = array<i64: 2>, scalar_prefetch = 0 : i64, scratch_operands = 0 : i64, tpu.core_type = #tpu.core_type<tc>, window_params = [{transform_indices = @transform_0, window_bounds = array<i64: 8, 32>}, {transform_indices = @transform_1, window_bounds = array<i64: 1, 1, 8>}, {pipeline_mode = #tpu.pipeline_mode<synchronous>, transform_indices = @transform_2, window_bounds = array<i64: 32, 96>}, {pipeline_mode = #tpu.pipeline_mode<synchronous>, transform_indices = @transform_3, window_bounds = array<i64: 32, 32>}, {pipeline_mode = #tpu.pipeline_mode<synchronous>, transform_indices = @transform_4, window_bounds = array<i64: 32, 64>}, {pipeline_mode = #tpu.pipeline_mode<synchronous>, transform_indices = @transform_5, window_bounds = array<i64: 64, 32>}, {pipeline_mode = #tpu.pipeline_mode<synchronous>, transform_indices = @transform_6, window_bounds = array<i64: 10, 96>}, {pipeline_mode = #tpu.pipeline_mode<synchronous>, transform_indices = @transform_7, window_bounds = array<i64: 32, 128>}, {pipeline_mode = #tpu.pipeline_mode<synchronous>, transform_indices = @transform_8, window_bounds = array<i64: 1, 128>}, {pipeline_mode = #tpu.pipeline_mode<synchronous>, transform_indices = @transform_9, window_bounds = array<i64: 2, 128>}]} {
    %c0 = arith.constant 0 : index
    %c0_0 = arith.constant 0 : index
    %0 = vector.load %arg1[%c0, %c0_0] : memref<8x32xbf16, #tpu.memory_space<vmem>>, vector<8x32xbf16>
    %c0_1 = arith.constant 0 : index
    %c0_2 = arith.constant 0 : index
    %c0_3 = arith.constant 0 : index
    %1 = vector.load %arg2[%c0_1, %c0_2, %c0_3] : memref<1x1x8xf32, #tpu.memory_space<vmem>>, vector<1x1x8xf32>
    %2 = vector.shape_cast %1 : vector<1x1x8xf32> to vector<1x8xf32>
    %c0_4 = arith.constant 0 : index
    %c0_5 = arith.constant 0 : index
    %3 = vector.load %arg3[%c0_4, %c0_5] : memref<32x96xbf16, #tpu.memory_space<vmem>>, vector<32x96xbf16>
    %c0_6 = arith.constant 0 : index
    %c0_7 = arith.constant 0 : index
    %4 = vector.load %arg4[%c0_6, %c0_7] : memref<32x32xbf16, #tpu.memory_space<vmem>>, vector<32x32xbf16>
    %c0_8 = arith.constant 0 : index
    %c0_9 = arith.constant 0 : index
    %5 = vector.load %arg5[%c0_8, %c0_9] : memref<32x64xbf16, #tpu.memory_space<vmem>>, vector<32x64xbf16>
    %c0_10 = arith.constant 0 : index
    %c0_11 = arith.constant 0 : index
    %6 = vector.load %arg6[%c0_10, %c0_11] : memref<64x32xbf16, #tpu.memory_space<vmem>>, vector<64x32xbf16>
    %c0_12 = arith.constant 0 : index
    %c0_13 = arith.constant 0 : index
    %7 = vector.load %arg7[%c0_12, %c0_13] : memref<10x96xf32, #tpu.memory_space<vmem>>, vector<10x96xf32>
    %8 = vector.extract_strided_slice %7 {offsets = [0, 0], sizes = [1, 96], strides = [1, 1]} : vector<10x96xf32> to vector<1x96xf32>
    %9 = vector.extract_strided_slice %7 {offsets = [1, 0], sizes = [1, 64], strides = [1, 1]} : vector<10x96xf32> to vector<1x64xf32>
    %10 = vector.extract_strided_slice %7 {offsets = [2, 0], sizes = [1, 32], strides = [1, 1]} : vector<10x96xf32> to vector<1x32xf32>
    %11 = vector.extract_strided_slice %7 {offsets = [3, 0], sizes = [1, 32], strides = [1, 1]} : vector<10x96xf32> to vector<1x32xf32>
    %12 = vector.extract_strided_slice %7 {offsets = [4, 0], sizes = [1, 32], strides = [1, 1]} : vector<10x96xf32> to vector<1x32xf32>
    %13 = vector.extract_strided_slice %7 {offsets = [5, 0], sizes = [1, 32], strides = [1, 1]} : vector<10x96xf32> to vector<1x32xf32>
    %14 = vector.extract_strided_slice %7 {offsets = [6, 0], sizes = [1, 32], strides = [1, 1]} : vector<10x96xf32> to vector<1x32xf32>
    %15 = vector.extract_strided_slice %7 {offsets = [7, 0], sizes = [1, 32], strides = [1, 1]} : vector<10x96xf32> to vector<1x32xf32>
    %16 = arith.extf %0 : vector<8x32xbf16> to vector<8x32xf32>
    %17 = arith.truncf %16 : vector<8x32xf32> to vector<8x32xbf16>
    %cst = arith.constant dense<0.000000e+00> : vector<8x96xf32>
    %18 = tpu.matmul %17, %3, %cst {dimension_numbers = #tpu.dot_dimension_numbers<[1], [0], [0], [1], [0, 0, 1, 1], [], []>} : vector<8x32xbf16>, vector<32x96xbf16>, vector<8x96xf32> -> vector<8x96xf32>
    %19 = vector.broadcast %8 : vector<1x96xf32> to vector<8x96xf32>
    %20 = arith.addf %18, %19 : vector<8x96xf32>
    %21 = vector.extract_strided_slice %20 {offsets = [0, 0], sizes = [8, 8], strides = [1, 1]} : vector<8x96xf32> to vector<8x8xf32>
    %22 = arith.truncf %21 : vector<8x8xf32> to vector<8x8xbf16>
    %23 = vector.extract_strided_slice %20 {offsets = [0, 32], sizes = [8, 8], strides = [1, 1]} : vector<8x96xf32> to vector<8x8xf32>
    %24 = arith.truncf %23 : vector<8x8xf32> to vector<8x8xbf16>
    %25 = vector.extract_strided_slice %20 {offsets = [0, 64], sizes = [8, 8], strides = [1, 1]} : vector<8x96xf32> to vector<8x8xf32>
    %26 = arith.truncf %25 : vector<8x8xf32> to vector<8x8xbf16>
    %cst_14 = arith.constant dense<0.000000e+00> : vector<8x8xf32>
    %27 = tpu.matmul %22, %24, %cst_14 {dimension_numbers = #tpu.dot_dimension_numbers<[1], [1], [0], [0], [0, 0, 1, 0], [], []>} : vector<8x8xbf16>, vector<8x8xbf16>, vector<8x8xf32> -> vector<8x8xf32>
    %28 = vector.broadcast %2 : vector<1x8xf32> to vector<8x8xf32>
    %29 = arith.addf %27, %28 : vector<8x8xf32>
    %cst_15 = arith.constant dense<0xFF800000> : vector<8xf32>
    %30 = vector.multi_reduction <maximumf>, %29, %cst_15 [1] : vector<8x8xf32> to vector<8xf32>
    %31 = vector.shape_cast %30 : vector<8xf32> to vector<8x1xf32>
    %32 = vector.broadcast %31 : vector<8x1xf32> to vector<8x8xf32>
    %33 = arith.subf %29, %32 : vector<8x8xf32>
    %34 = math.exp %33 : vector<8x8xf32>
    %cst_16 = arith.constant dense<0.000000e+00> : vector<8xf32>
    %35 = vector.multi_reduction <add>, %34, %cst_16 [1] : vector<8x8xf32> to vector<8xf32>
    %36 = vector.shape_cast %35 : vector<8xf32> to vector<8x1xf32>
    %37 = arith.truncf %34 : vector<8x8xf32> to vector<8x8xbf16>
    %cst_17 = arith.constant dense<0.000000e+00> : vector<8x8xf32>
    %38 = tpu.matmul %37, %26, %cst_17 {dimension_numbers = #tpu.dot_dimension_numbers<[1], [0], [0], [1], [0, 0, 1, 1], [], []>} : vector<8x8xbf16>, vector<8x8xbf16>, vector<8x8xf32> -> vector<8x8xf32>
    %39 = tpu.reciprocal %36 {approx = true} : vector<8x1xf32> -> vector<8x1xf32>
    %40 = vector.broadcast %39 : vector<8x1xf32> to vector<8x8xf32>
    %41 = arith.mulf %38, %40 : vector<8x8xf32>
    %42 = vector.extract_strided_slice %20 {offsets = [0, 8], sizes = [8, 8], strides = [1, 1]} : vector<8x96xf32> to vector<8x8xf32>
    %43 = arith.truncf %42 : vector<8x8xf32> to vector<8x8xbf16>
    %44 = vector.extract_strided_slice %20 {offsets = [0, 40], sizes = [8, 8], strides = [1, 1]} : vector<8x96xf32> to vector<8x8xf32>
    %45 = arith.truncf %44 : vector<8x8xf32> to vector<8x8xbf16>
    %46 = vector.extract_strided_slice %20 {offsets = [0, 72], sizes = [8, 8], strides = [1, 1]} : vector<8x96xf32> to vector<8x8xf32>
    %47 = arith.truncf %46 : vector<8x8xf32> to vector<8x8xbf16>
    %cst_18 = arith.constant dense<0.000000e+00> : vector<8x8xf32>
    %48 = tpu.matmul %43, %45, %cst_18 {dimension_numbers = #tpu.dot_dimension_numbers<[1], [1], [0], [0], [0, 0, 1, 0], [], []>} : vector<8x8xbf16>, vector<8x8xbf16>, vector<8x8xf32> -> vector<8x8xf32>
    %49 = vector.broadcast %2 : vector<1x8xf32> to vector<8x8xf32>
    %50 = arith.addf %48, %49 : vector<8x8xf32>
    %cst_19 = arith.constant dense<0xFF800000> : vector<8xf32>
    %51 = vector.multi_reduction <maximumf>, %50, %cst_19 [1] : vector<8x8xf32> to vector<8xf32>
    %52 = vector.shape_cast %51 : vector<8xf32> to vector<8x1xf32>
    %53 = vector.broadcast %52 : vector<8x1xf32> to vector<8x8xf32>
    %54 = arith.subf %50, %53 : vector<8x8xf32>
    %55 = math.exp %54 : vector<8x8xf32>
    %cst_20 = arith.constant dense<0.000000e+00> : vector<8xf32>
    %56 = vector.multi_reduction <add>, %55, %cst_20 [1] : vector<8x8xf32> to vector<8xf32>
    %57 = vector.shape_cast %56 : vector<8xf32> to vector<8x1xf32>
    %58 = arith.truncf %55 : vector<8x8xf32> to vector<8x8xbf16>
    %cst_21 = arith.constant dense<0.000000e+00> : vector<8x8xf32>
    %59 = tpu.matmul %58, %47, %cst_21 {dimension_numbers = #tpu.dot_dimension_numbers<[1], [0], [0], [1], [0, 0, 1, 1], [], []>} : vector<8x8xbf16>, vector<8x8xbf16>, vector<8x8xf32> -> vector<8x8xf32>
    %60 = tpu.reciprocal %57 {approx = true} : vector<8x1xf32> -> vector<8x1xf32>
    %61 = vector.broadcast %60 : vector<8x1xf32> to vector<8x8xf32>
    %62 = arith.mulf %59, %61 : vector<8x8xf32>
    %63 = vector.extract_strided_slice %20 {offsets = [0, 16], sizes = [8, 8], strides = [1, 1]} : vector<8x96xf32> to vector<8x8xf32>
    %64 = arith.truncf %63 : vector<8x8xf32> to vector<8x8xbf16>
    %65 = vector.extract_strided_slice %20 {offsets = [0, 48], sizes = [8, 8], strides = [1, 1]} : vector<8x96xf32> to vector<8x8xf32>
    %66 = arith.truncf %65 : vector<8x8xf32> to vector<8x8xbf16>
    %67 = vector.extract_strided_slice %20 {offsets = [0, 80], sizes = [8, 8], strides = [1, 1]} : vector<8x96xf32> to vector<8x8xf32>
    %68 = arith.truncf %67 : vector<8x8xf32> to vector<8x8xbf16>
    %cst_22 = arith.constant dense<0.000000e+00> : vector<8x8xf32>
    %69 = tpu.matmul %64, %66, %cst_22 {dimension_numbers = #tpu.dot_dimension_numbers<[1], [1], [0], [0], [0, 0, 1, 0], [], []>} : vector<8x8xbf16>, vector<8x8xbf16>, vector<8x8xf32> -> vector<8x8xf32>
    %70 = vector.broadcast %2 : vector<1x8xf32> to vector<8x8xf32>
    %71 = arith.addf %69, %70 : vector<8x8xf32>
    %cst_23 = arith.constant dense<0xFF800000> : vector<8xf32>
    %72 = vector.multi_reduction <maximumf>, %71, %cst_23 [1] : vector<8x8xf32> to vector<8xf32>
    %73 = vector.shape_cast %72 : vector<8xf32> to vector<8x1xf32>
    %74 = vector.broadcast %73 : vector<8x1xf32> to vector<8x8xf32>
    %75 = arith.subf %71, %74 : vector<8x8xf32>
    %76 = math.exp %75 : vector<8x8xf32>
    %cst_24 = arith.constant dense<0.000000e+00> : vector<8xf32>
    %77 = vector.multi_reduction <add>, %76, %cst_24 [1] : vector<8x8xf32> to vector<8xf32>
    %78 = vector.shape_cast %77 : vector<8xf32> to vector<8x1xf32>
    %79 = arith.truncf %76 : vector<8x8xf32> to vector<8x8xbf16>
    %cst_25 = arith.constant dense<0.000000e+00> : vector<8x8xf32>
    %80 = tpu.matmul %79, %68, %cst_25 {dimension_numbers = #tpu.dot_dimension_numbers<[1], [0], [0], [1], [0, 0, 1, 1], [], []>} : vector<8x8xbf16>, vector<8x8xbf16>, vector<8x8xf32> -> vector<8x8xf32>
    %81 = tpu.reciprocal %78 {approx = true} : vector<8x1xf32> -> vector<8x1xf32>
    %82 = vector.broadcast %81 : vector<8x1xf32> to vector<8x8xf32>
    %83 = arith.mulf %80, %82 : vector<8x8xf32>
    %84 = vector.extract_strided_slice %20 {offsets = [0, 24], sizes = [8, 8], strides = [1, 1]} : vector<8x96xf32> to vector<8x8xf32>
    %85 = arith.truncf %84 : vector<8x8xf32> to vector<8x8xbf16>
    %86 = vector.extract_strided_slice %20 {offsets = [0, 56], sizes = [8, 8], strides = [1, 1]} : vector<8x96xf32> to vector<8x8xf32>
    %87 = arith.truncf %86 : vector<8x8xf32> to vector<8x8xbf16>
    %88 = vector.extract_strided_slice %20 {offsets = [0, 88], sizes = [8, 8], strides = [1, 1]} : vector<8x96xf32> to vector<8x8xf32>
    %89 = arith.truncf %88 : vector<8x8xf32> to vector<8x8xbf16>
    %cst_26 = arith.constant dense<0.000000e+00> : vector<8x8xf32>
    %90 = tpu.matmul %85, %87, %cst_26 {dimension_numbers = #tpu.dot_dimension_numbers<[1], [1], [0], [0], [0, 0, 1, 0], [], []>} : vector<8x8xbf16>, vector<8x8xbf16>, vector<8x8xf32> -> vector<8x8xf32>
    %91 = vector.broadcast %2 : vector<1x8xf32> to vector<8x8xf32>
    %92 = arith.addf %90, %91 : vector<8x8xf32>
    %cst_27 = arith.constant dense<0xFF800000> : vector<8xf32>
    %93 = vector.multi_reduction <maximumf>, %92, %cst_27 [1] : vector<8x8xf32> to vector<8xf32>
    %94 = vector.shape_cast %93 : vector<8xf32> to vector<8x1xf32>
    %95 = vector.broadcast %94 : vector<8x1xf32> to vector<8x8xf32>
    %96 = arith.subf %92, %95 : vector<8x8xf32>
    %97 = math.exp %96 : vector<8x8xf32>
    %cst_28 = arith.constant dense<0.000000e+00> : vector<8xf32>
    %98 = vector.multi_reduction <add>, %97, %cst_28 [1] : vector<8x8xf32> to vector<8xf32>
    %99 = vector.shape_cast %98 : vector<8xf32> to vector<8x1xf32>
    %100 = arith.truncf %97 : vector<8x8xf32> to vector<8x8xbf16>
    %cst_29 = arith.constant dense<0.000000e+00> : vector<8x8xf32>
    %101 = tpu.matmul %100, %89, %cst_29 {dimension_numbers = #tpu.dot_dimension_numbers<[1], [0], [0], [1], [0, 0, 1, 1], [], []>} : vector<8x8xbf16>, vector<8x8xbf16>, vector<8x8xf32> -> vector<8x8xf32>
    %102 = tpu.reciprocal %99 {approx = true} : vector<8x1xf32> -> vector<8x1xf32>
    %103 = vector.broadcast %102 : vector<8x1xf32> to vector<8x8xf32>
    %104 = arith.mulf %101, %103 : vector<8x8xf32>
    %105 = tpu.concatenate %41, %62, %83, %104 in 1 : vector<8x8xf32>, vector<8x8xf32>, vector<8x8xf32>, vector<8x8xf32> -> vector<8x32xf32>
    %106 = arith.truncf %105 : vector<8x32xf32> to vector<8x32xbf16>
    %cst_30 = arith.constant dense<0.000000e+00> : vector<8x32xf32>
    %107 = tpu.matmul %106, %4, %cst_30 {dimension_numbers = #tpu.dot_dimension_numbers<[1], [0], [0], [1], [0, 0, 1, 1], [], []>} : vector<8x32xbf16>, vector<32x32xbf16>, vector<8x32xf32> -> vector<8x32xf32>
    %108 = vector.broadcast %10 : vector<1x32xf32> to vector<8x32xf32>
    %109 = arith.addf %107, %108 : vector<8x32xf32>
    %110 = arith.addf %16, %109 : vector<8x32xf32>
    %cst_31 = arith.constant dense<0.000000e+00> : vector<8xf32>
    %111 = vector.multi_reduction <add>, %110, %cst_31 [1] : vector<8x32xf32> to vector<8xf32>
    %112 = vector.shape_cast %111 : vector<8xf32> to vector<8x1xf32>
    %cst_32 = arith.constant 3.200000e+01 : f32
    %113 = vector.broadcast %cst_32 : f32 to vector<8x1xf32>
    %114 = arith.divf %112, %113 : vector<8x1xf32>
    %115 = vector.broadcast %114 : vector<8x1xf32> to vector<8x32xf32>
    %116 = arith.subf %110, %115 : vector<8x32xf32>
    %117 = arith.mulf %116, %116 : vector<8x32xf32>
    %cst_33 = arith.constant dense<0.000000e+00> : vector<8xf32>
    %118 = vector.multi_reduction <add>, %117, %cst_33 [1] : vector<8x32xf32> to vector<8xf32>
    %119 = vector.shape_cast %118 : vector<8xf32> to vector<8x1xf32>
    %cst_34 = arith.constant 3.200000e+01 : f32
    %120 = vector.broadcast %cst_34 : f32 to vector<8x1xf32>
    %121 = arith.divf %119, %120 : vector<8x1xf32>
    %122 = vector.broadcast %114 : vector<8x1xf32> to vector<8x32xf32>
    %123 = arith.subf %110, %122 : vector<8x32xf32>
    %cst_35 = arith.constant 1.000000e-07 : f32
    %124 = vector.broadcast %cst_35 : f32 to vector<8x1xf32>
    %125 = arith.addf %121, %124 : vector<8x1xf32>
    %126 = math.rsqrt %125 : vector<8x1xf32>
    %127 = vector.broadcast %126 : vector<8x1xf32> to vector<8x32xf32>
    %128 = arith.mulf %123, %127 : vector<8x32xf32>
    %129 = vector.broadcast %11 : vector<1x32xf32> to vector<8x32xf32>
    %130 = arith.mulf %128, %129 : vector<8x32xf32>
    %131 = vector.broadcast %12 : vector<1x32xf32> to vector<8x32xf32>
    %132 = arith.addf %130, %131 : vector<8x32xf32>
    %133 = arith.truncf %132 : vector<8x32xf32> to vector<8x32xbf16>
    %cst_36 = arith.constant dense<0.000000e+00> : vector<8x64xf32>
    %134 = tpu.matmul %133, %5, %cst_36 {dimension_numbers = #tpu.dot_dimension_numbers<[1], [0], [0], [1], [0, 0, 1, 1], [], []>} : vector<8x32xbf16>, vector<32x64xbf16>, vector<8x64xf32> -> vector<8x64xf32>
    %135 = vector.broadcast %9 : vector<1x64xf32> to vector<8x64xf32>
    %136 = arith.addf %134, %135 : vector<8x64xf32>
    %cst_37 = arith.constant 5.000000e-01 : f32
    %137 = vector.broadcast %cst_37 : f32 to vector<8x64xf32>
    %138 = arith.mulf %137, %136 : vector<8x64xf32>
    %cst_38 = arith.constant 0.707106769 : f32
    %139 = vector.broadcast %cst_38 : f32 to vector<8x64xf32>
    %140 = arith.mulf %136, %139 : vector<8x64xf32>
    %141 = math.absf %140 : vector<8x64xf32>
    %cst_39 = arith.constant 0.327591091 : f32
    %142 = vector.broadcast %cst_39 : f32 to vector<8x64xf32>
    %143 = arith.mulf %142, %141 : vector<8x64xf32>
    %cst_40 = arith.constant 1.000000e+00 : f32
    %144 = vector.broadcast %cst_40 : f32 to vector<8x64xf32>
    %145 = arith.addf %144, %143 : vector<8x64xf32>
    %cst_41 = arith.constant 1.000000e+00 : f32
    %146 = vector.broadcast %cst_41 : f32 to vector<8x64xf32>
    %147 = arith.divf %146, %145 : vector<8x64xf32>
    %cst_42 = arith.constant 1.06140542 : f32
    %148 = vector.broadcast %cst_42 : f32 to vector<8x64xf32>
    %149 = arith.mulf %148, %147 : vector<8x64xf32>
    %cst_43 = arith.constant 1.45315206 : f32
    %150 = vector.broadcast %cst_43 : f32 to vector<8x64xf32>
    %151 = arith.subf %149, %150 : vector<8x64xf32>
    %152 = arith.mulf %151, %147 : vector<8x64xf32>
    %cst_44 = arith.constant 1.42141378 : f32
    %153 = vector.broadcast %cst_44 : f32 to vector<8x64xf32>
    %154 = arith.addf %152, %153 : vector<8x64xf32>
    %155 = arith.mulf %154, %147 : vector<8x64xf32>
    %cst_45 = arith.constant 0.284496725 : f32
    %156 = vector.broadcast %cst_45 : f32 to vector<8x64xf32>
    %157 = arith.subf %155, %156 : vector<8x64xf32>
    %158 = arith.mulf %157, %147 : vector<8x64xf32>
    %cst_46 = arith.constant 0.254829586 : f32
    %159 = vector.broadcast %cst_46 : f32 to vector<8x64xf32>
    %160 = arith.addf %158, %159 : vector<8x64xf32>
    %161 = arith.mulf %160, %147 : vector<8x64xf32>
    %cst_47 = arith.constant 0.000000e+00 : f32
    %162 = vector.broadcast %cst_47 : f32 to vector<8x64xf32>
    %163 = arith.subf %162, %141 : vector<8x64xf32>
    %164 = arith.mulf %163, %141 : vector<8x64xf32>
    %165 = math.exp %164 : vector<8x64xf32>
    %166 = arith.mulf %161, %165 : vector<8x64xf32>
    %cst_48 = arith.constant 1.000000e+00 : f32
    %167 = vector.broadcast %cst_48 : f32 to vector<8x64xf32>
    %168 = arith.subf %167, %166 : vector<8x64xf32>
    %cst_49 = arith.constant 0.000000e+00 : f32
    %169 = vector.broadcast %cst_49 : f32 to vector<8x64xf32>
    %170 = arith.cmpf olt, %140, %169 : vector<8x64xf32>
    %cst_50 = arith.constant 0.000000e+00 : f32
    %171 = vector.broadcast %cst_50 : f32 to vector<8x64xf32>
    %172 = arith.subf %171, %168 : vector<8x64xf32>
    %173 = arith.select %170, %172, %168 : vector<8x64xi1>, vector<8x64xf32>
    %cst_51 = arith.constant 1.000000e+00 : f32
    %174 = vector.broadcast %cst_51 : f32 to vector<8x64xf32>
    %175 = arith.addf %174, %173 : vector<8x64xf32>
    %176 = arith.mulf %138, %175 : vector<8x64xf32>
    %177 = arith.truncf %176 : vector<8x64xf32> to vector<8x64xbf16>
    %cst_52 = arith.constant dense<0.000000e+00> : vector<8x32xf32>
    %178 = tpu.matmul %177, %6, %cst_52 {dimension_numbers = #tpu.dot_dimension_numbers<[1], [0], [0], [1], [0, 0, 1, 1], [], []>} : vector<8x64xbf16>, vector<64x32xbf16>, vector<8x32xf32> -> vector<8x32xf32>
    %179 = vector.broadcast %13 : vector<1x32xf32> to vector<8x32xf32>
    %180 = arith.addf %178, %179 : vector<8x32xf32>
    %181 = arith.addf %132, %180 : vector<8x32xf32>
    %cst_53 = arith.constant dense<0.000000e+00> : vector<8xf32>
    %182 = vector.multi_reduction <add>, %181, %cst_53 [1] : vector<8x32xf32> to vector<8xf32>
    %183 = vector.shape_cast %182 : vector<8xf32> to vector<8x1xf32>
    %cst_54 = arith.constant 3.200000e+01 : f32
    %184 = vector.broadcast %cst_54 : f32 to vector<8x1xf32>
    %185 = arith.divf %183, %184 : vector<8x1xf32>
    %186 = vector.broadcast %185 : vector<8x1xf32> to vector<8x32xf32>
    %187 = arith.subf %181, %186 : vector<8x32xf32>
    %188 = arith.mulf %187, %187 : vector<8x32xf32>
    %cst_55 = arith.constant dense<0.000000e+00> : vector<8xf32>
    %189 = vector.multi_reduction <add>, %188, %cst_55 [1] : vector<8x32xf32> to vector<8xf32>
    %190 = vector.shape_cast %189 : vector<8xf32> to vector<8x1xf32>
    %cst_56 = arith.constant 3.200000e+01 : f32
    %191 = vector.broadcast %cst_56 : f32 to vector<8x1xf32>
    %192 = arith.divf %190, %191 : vector<8x1xf32>
    %193 = vector.broadcast %185 : vector<8x1xf32> to vector<8x32xf32>
    %194 = arith.subf %181, %193 : vector<8x32xf32>
    %cst_57 = arith.constant 1.000000e-07 : f32
    %195 = vector.broadcast %cst_57 : f32 to vector<8x1xf32>
    %196 = arith.addf %192, %195 : vector<8x1xf32>
    %197 = math.rsqrt %196 : vector<8x1xf32>
    %198 = vector.broadcast %197 : vector<8x1xf32> to vector<8x32xf32>
    %199 = arith.mulf %194, %198 : vector<8x32xf32>
    %200 = vector.broadcast %14 : vector<1x32xf32> to vector<8x32xf32>
    %201 = arith.mulf %199, %200 : vector<8x32xf32>
    %202 = vector.broadcast %15 : vector<1x32xf32> to vector<8x32xf32>
    %203 = arith.addf %201, %202 : vector<8x32xf32>
    %cst_58 = arith.constant dense<0.000000e+00> : vector<32xf32>
    %204 = vector.multi_reduction <add>, %203, %cst_58 [0] : vector<8x32xf32> to vector<32xf32>
    %205 = vector.shape_cast %204 : vector<32xf32> to vector<1x32xf32>
    %cst_59 = arith.constant 8.000000e+00 : f32
    %206 = vector.broadcast %cst_59 : f32 to vector<1x32xf32>
    %207 = arith.divf %205, %206 : vector<1x32xf32>
    %208 = arith.truncf %207 : vector<1x32xf32> to vector<1x32xbf16>
    %c0_60 = arith.constant 0 : index
    %c0_61 = arith.constant 0 : index
    %209 = vector.load %arg8[%c0_60, %c0_61] : memref<32x128xbf16, #tpu.memory_space<vmem>>, vector<32x128xbf16>
    %cst_62 = arith.constant dense<0.000000e+00> : vector<1x128xf32>
    %210 = tpu.matmul %208, %209, %cst_62 {dimension_numbers = #tpu.dot_dimension_numbers<[1], [0], [0], [1], [0, 0, 1, 1], [], []>} : vector<1x32xbf16>, vector<32x128xbf16>, vector<1x128xf32> -> vector<1x128xf32>
    %c0_63 = arith.constant 0 : index
    %c0_64 = arith.constant 0 : index
    %211 = vector.load %arg9[%c0_63, %c0_64] : memref<1x128xf32, #tpu.memory_space<vmem>>, vector<1x128xf32>
    %212 = arith.addf %210, %211 : vector<1x128xf32>
    %213 = arith.index_cast %arg0 : i32 to index
    %c0_65 = arith.constant 0 : index
    %214 = vector.load %arg10[%213, %c0_65] : memref<2x128xf32, #tpu.memory_space<vmem>>, vector<1x128xf32>
    tpu.vector_store %arg10[%213, %c0_65], %212 {strides = array<i32>} : memref<2x128xf32, #tpu.memory_space<vmem>>, vector<1x128xf32>,
    return
  }
  func.func @transform_0(%arg0: i32) -> (i32, i32) {
    %c0_i32 = arith.constant 0 : i32
    %c0_i32_0 = arith.constant 0 : i32
    return %arg0, %c0_i32 : i32, i32
  }
  func.func @transform_1(%arg0: i32) -> (i32, i32, i32) {
    %c0_i32 = arith.constant 0 : i32
    %c0_i32_0 = arith.constant 0 : i32
    %c0_i32_1 = arith.constant 0 : i32
    return %arg0, %c0_i32, %c0_i32_0 : i32, i32, i32
  }
  func.func @transform_2(%arg0: i32) -> (i32, i32) {
    %c0_i32 = arith.constant 0 : i32
    %c0_i32_0 = arith.constant 0 : i32
    %c0_i32_1 = arith.constant 0 : i32
    return %c0_i32, %c0_i32_0 : i32, i32
  }
  func.func @transform_3(%arg0: i32) -> (i32, i32) {
    %c0_i32 = arith.constant 0 : i32
    %c0_i32_0 = arith.constant 0 : i32
    %c0_i32_1 = arith.constant 0 : i32
    return %c0_i32, %c0_i32_0 : i32, i32
  }
  func.func @transform_4(%arg0: i32) -> (i32, i32) {
    %c0_i32 = arith.constant 0 : i32
    %c0_i32_0 = arith.constant 0 : i32
    %c0_i32_1 = arith.constant 0 : i32
    return %c0_i32, %c0_i32_0 : i32, i32
  }
  func.func @transform_5(%arg0: i32) -> (i32, i32) {
    %c0_i32 = arith.constant 0 : i32
    %c0_i32_0 = arith.constant 0 : i32
    %c0_i32_1 = arith.constant 0 : i32
    return %c0_i32, %c0_i32_0 : i32, i32
  }
  func.func @transform_6(%arg0: i32) -> (i32, i32) {
    %c0_i32 = arith.constant 0 : i32
    %c0_i32_0 = arith.constant 0 : i32
    %c0_i32_1 = arith.constant 0 : i32
    return %c0_i32, %c0_i32_0 : i32, i32
  }
  func.func @transform_7(%arg0: i32) -> (i32, i32) {
    %c0_i32 = arith.constant 0 : i32
    %c0_i32_0 = arith.constant 0 : i32
    %c0_i32_1 = arith.constant 0 : i32
    return %c0_i32, %c0_i32_0 : i32, i32
  }
  func.func @transform_8(%arg0: i32) -> (i32, i32) {
    %c0_i32 = arith.constant 0 : i32
    %c0_i32_0 = arith.constant 0 : i32
    %c0_i32_1 = arith.constant 0 : i32
    return %c0_i32, %c0_i32_0 : i32, i32
  }
  func.func @transform_9(%arg0: i32) -> (i32, i32) {
    %c0_i32 = arith.constant 0 : i32
    %c0_i32_0 = arith.constant 0 : i32
    %c0_i32_1 = arith.constant 0 : i32
    return %c0_i32, %c0_i32_0 : i32, i32
  }
}

</mosaic_0001>

<bundles_post_ra>
// kernel: toxic_model_forward.3
= control target key start
LH: loop header
LB: loop body
LE: loop exit
PB: predicated region body
PF: predicated region fallthrough
CT: control target
= control target key end

     0   :  { %14 = vsyncpa [#allocation3], 0  ;;  %s1199_s30 = smov 0   ;;  %s1344_s0 = inlined_call_operand.vmem [shape: bf16[16,32], index: 0, kind: input, shape index: {}]   ;;  %s1345_s1 = inlined_call_operand.vmem [shape: f32[2,1,8], index: 1, kind: input, shape index: {}]   ;;  %s1346_s2 = inlined_call_operand.vmem [shape: bf16[32,96], index: 2, kind: input, shape index: {}]   ;;  %s1347_s3 = inlined_call_operand.vmem [shape: bf16[32,32], index: 3, kind: input, shape index: {}]   ;;  %s1348_s4 = inlined_call_operand.vmem [shape: bf16[32,64], index: 4, kind: input, shape index: {}]   ;;  %s1349_s5 = inlined_call_operand.vmem [shape: bf16[64,32], index: 5, kind: input, shape index: {}]   ;;  %s1350_s6 = inlined_call_operand.vmem [shape: f32[10,96], index: 6, kind: input, shape index: {}]   ;;  %s1351_s7 = inlined_call_operand.vmem [shape: bf16[32,128], index: 7, kind: input, shape index: {}]   ;;  %s1352_s8 = inlined_call_operand.vmem [shape: f32[1,128], index: 8, kind: input, shape index: {}]   ;;  %s1353_s9 = inlined_call_operand.hbm [shape: f32[2,128], index: 9, kind: output, shape index: {}]  }
   0x1 LB: > { %s1205_s10 = sadd.s32 4294967295, %s1130_s30   ;;  %p947_p0 = scmp.ge.s32.totalorder %s1130_s30, 1  ;;  %s1130_s30 = sphi %s1199_s30, %s20_s30  }
   0x2   : > { %p290_p1 = scmp.lt.s32.totalorder %s1130_s30, 3 }
   0x4   : > { %p291_p2 = pnand %p947_p0, %p290_p1 }
   0x5   : > { %p323_p3 = scmp.lt.s32.totalorder (!%p291_p2), %s1205_s10, 1  ;;  %s1132_s25 = smov (!%p291_p2), 104  }
   0x6   : > { %294 = sbr.rel (%p291_p2) target bundleno = 1962 (0x7aa), region = 56  ;;  %s1133_s26 = smov (!%p291_p2), 120  }
   0x7   : > { %s1134_s27 = smov (!%p291_p2), 96   ;;  %s1135_s28 = smov (!%p291_p2), 80  }
   0x8   : > { %s1136_s29 = smov (!%p291_p2), 72   ;;  %s1137_s11 = smov (!%p291_p2), 88  }
   0x9   : > { %s1138_s12 = smov (!%p291_p2), 64   ;;  %s1139_s13 = smov (!%p291_p2), 112  }
   0xa   : > { %s1140_s14 = smov (!%p291_p2), 56   ;;  %s1142_s18 = smov (!%p291_p2), 40  }
   0xb   : > { %v1018_v0 = vld [vmem:[%s1346_s2 + $0x8] sm:$0xff]  ;;  %v1017_v1 = vld [vmem:[%s1346_s2] sm:$0xff]  ;;  %s1217_s15 = scalar_select %p323_p3, %s1205_s10, 1  ;;  %vm368_vm0 = vcmask 261120   ;;  %vm392_vm1 = vcmask 64512   ;;  %vm427_vm2 = vcmask 1043456  }
   0xc   : > { %378 = vmatpush.bf16.msra.mxu0 %v1018_v0  ;;  %v1234_v3 = vld [vmem:[%s1350_s6] sm:$0xff]  ;;  %s1144_s20 = smov 16   ;;  %s1145_s21 = smov 24   ;;  %vm627_vm3 = vcmask 130048   ;;  %vm629_vm4 = vcmask 195584   ;;  %vm791_vm14 = vcmask 523264  }
   0xd   : > { %s948_s16 = sshll.u32 %s1217_s15, 2  ;;  %s329_s19 = scalar_lea.vmem %s1345_s1, %s1217_s15  ;;  %v355_v4 = vperm.slane %v1234_v3, 0 }
   0xe   : > { %s326_s22 = scalar_lea.vmem %s1344_s0, %s948_s16  ;;  %v1063_v24 = vld [vmem:[%s329_s19] ss:$0 sm:$0xff]  ;;  %s1141_s15 = smov 48  }
   0xf   : > { %v1227_v2 = vld [vmem:[%s326_s22] sm:$0xf]  ;;  %s1143_s19 = smov 8   ;;  %p1036_p4 = scmp.eq.s32.totalorder %s1205_s10, 1 }
  0x10   : > { %379 = vmatpush.bf16.msra.mxu0 %v1017_v1 }
  0x13   : > { %957 = vmatmul.msk.bf16.vlgmr.msra.gmra.mxu0 %vm368_vm0, %v1227_v2 }
  0x90   : > { %v381_v5 = vpop.f32.mrf.mxu0 }
  0x91   : > { %v382_v6 = vadd.f32 %v381_v5, %v355_v4 }
  0x93   : > { %v1237_v7 = vpack.c.bf16 %v382_v6, %v382_v6 }
  0x95   : > { %558 = vrot.lane.b32.xlu2 %v1237_v7, %s1132_s25  ;;  %446 = vrot.lane.b32.xlu1 %v1237_v7, %s1133_s26  ;;  %s1148_s25 = smov [#allocation2]  }
  0x96   : > { %390 = vrot.lane.b32.xlu0 %v1237_v7, %s1134_s27  ;;  %s892_s26 = sshll.u32 %s1148_s25, 4  ;;  %s893_s26 = int_to_ptr.vmem [resolvable:$true] %s892_s26 }
  0x98   : > { %v383_v8 = vpop.f32.mrf.mxu0 }
  0x9d   : > { %504 = vrot.lane.b32.xlu2 %v1237_v7, %s1135_s28  ;;  %560 = vrot.lane.b32.xlu1 %v1237_v7, %s1136_s29  ;;  %s894_s29 = sshll.u32 %s1353_s9, 4  ;;  %s895_s29 = int_to_ptr.hbm [resolvable:$true] %s894_s29 }
  0x9e   : > { %448 = vrot.lane.b32.xlu0 %v1237_v7, %s1137_s11  ;;  %s1029_s11 = scalar_lea.vmem [#allocation2], %s1130_s30 }
  0xa5   : > { %422 = vrot.lane.b32.xlu2 %v1237_v7, %s1138_s12 }
  0xa6   : > { %502 = vrot.lane.b32.xlu0 %v1237_v7, %s1139_s13 }
  0xad   : > { %479 = vrot.lane.b32.xlu2 %v1237_v7, %s1140_s14 }
  0xef   : > { %v559_v9 = vpop.permute.xlu2 %558 }
  0xf7   : > { %v505_v10 = vpop.permute.xlu2 %504 }
  0xf8   : > { %v510_v11 = vsel %vm392_vm1, %v505_v10, 0 }
  0xf9   : > { %519 = vmatpush.bf16.xpose.msrb.mxu0 %v510_v11 }
  0xff   : > { %v423_v12 = vpop.permute.xlu2 %422 }
 0x100   : > { %v429_v13 = vsel %vm427_vm2, %v423_v12, 0 }
 0x101   : > { %438 = vmatpush.bf16.msra.mxu2 %v429_v13 }
 0x107   : > { %v480_v14 = vpop.permute.xlu2 %479  ;;  %v447_v15 = vpop.permute.xlu1 %446 }
 0x108   : > { %v391_v16 = vpop.permute.xlu0 %390  ;;  %v485_v17 = vsel %vm427_vm2, %v480_v14, 0 }
 0x109   : > { %v397_v18 = vsel %vm392_vm1, %v391_v16, 0  ;;  %494 = vmatpush.bf16.msrb.mxu2 %v485_v17 }
 0x10a   : > { %406 = vmatpush.bf16.xpose.msra.mxu1 %v397_v18 }
 0x10f   : > { %v561_v19 = vpop.permute.xlu1 %560 }
 0x110   : > { %v449_v20 = vpop.permute.xlu0 %448  ;;  %v566_v21 = vsel %vm392_vm1, %v561_v19, 0 }
 0x111   : > { %958 = vmatmul.msk.bf16.vlgmr.msra.gmra.mxu1 %vm392_vm1, %v1237_v7  ;;  %v454_v22 = vsel %vm392_vm1, %v449_v20, 0 }
 0x112   : > { %463 = vmatpush.bf16.xpose.msra.mxu3 %v454_v22 }
 0x118   : > { %v503_v23 = vpop.permute.xlu0 %502 }
 0x119   : > { %960 = vmatmul.msk.bf16.vlgmr.msra.gmra.mxu3 %vm392_vm1, %v447_v15  ;;  %962 = vmatmul.msk.bf16.vlgmr.msrb.gmra.mxu0 %vm392_vm1, %v503_v23 }
 0x11a   : > { %575 = vmatpush.bf16.xpose.msrb.mxu3 %v566_v21 }
 0x129   : > { %964 = vmatmul.msk.bf16.vlgmr.msrb.gmra.mxu3 %vm392_vm1, %v559_v9 }
 0x18e   : > { %v408_v25 = vpop.f32.mrf.mxu1 }
 0x18f   : > { %v409_v26 = vadd.f32 %v1063_v24, %v408_v25  ;;  %v1019_v25 = vld [vmem:[%s1347_s3] sm:$0xff] }
 0x191   : > { %v412_v27 = vsel %vm392_vm1, %v409_v26, -inf }
 0x192   : > { %413 = vmax.xlane.f32.xlu1 %v412_v27 }
 0x196   : > { %v410_v28 = vpop.f32.mrf.mxu1  ;;  %v521_v29 = vpop.f32.mrf.mxu0 }
 0x197   : > { %v522_v30 = vadd.f32 %v1063_v24, %v521_v29 }
 0x199   : > { %v525_v31 = vsel %vm392_vm1, %v522_v30, -inf }
 0x19a   : > { %526 = vmax.xlane.f32.xlu1 %v525_v31 }
 0x19c   : > { %v465_v32 = vpop.f32.mrf.mxu3 }
 0x19d   : > { %v466_v33 = vadd.f32 %v1063_v24, %v465_v32 }
 0x19e   : > { %v523_v34 = vpop.f32.mrf.mxu0 }
 0x19f   : > { %v469_v35 = vsel %vm392_vm1, %v466_v33, -inf }
 0x1a0   : > { %470 = vmax.xlane.f32.xlu0 %v469_v35 }
 0x1a4   : > { %v467_v36 = vpop.f32.mrf.mxu3 }
 0x1a5   : > { %v632_v36 = vperm.slane %v1234_v3, 2 }
 0x1ac   : > { %v577_v37 = vpop.f32.mrf.mxu3 }
 0x1ad   : > { %v578_v38 = vadd.f32 %v1063_v24, %v577_v37  ;;  %v1020_v24 = vld [vmem:[%s1347_s3 + $0x8] sm:$0xff]  ;;  %v354_v37 = vunpack.c.l.bf16 %v1227_v2 }
 0x1ae   : > { %654 = vmatpush.bf16.msra.mxu0 %v1020_v24 }
 0x1af   : > { %v581_v39 = vsel %vm392_vm1, %v578_v38, -inf }
 0x1b0   : > { %582 = vmax.xlane.f32.xlu2 %v581_v39 }
 0x1b2   : > { %655 = vmatpush.bf16.msra.mxu0 %v1019_v25 }
 0x1b3   : > { %535 = vrot.lane.b32.xlu1 %v1237_v7, %s1141_s15 }
 0x1b4   : > { %v579_v40 = vpop.f32.mrf.mxu3  ;;  %591 = vrot.lane.b32.xlu0 %v1237_v7, %s1142_s18 }
 0x205   : > { %v414_v41 = vpop.xlane.xlu1 %413 }
 0x206   : > { %v415_v42 = vsub.f32 %v409_v26, %v414_v41 }
 0x208   : > { %v416_v43 = vmul.f32 1.442695, %v415_v42 }
 0x20a   : > { %1064 = vpow2.f32 %v416_v43  ;;  %v1146_v43 = vmov 32.0  }
 0x20d   : > { %v527_v46 = vpop.xlane.xlu1 %526 }
 0x20e   : > { %v528_v49 = vsub.f32 %v522_v30, %v527_v46 }
 0x210   : > { %v1065_v44 = vpop.eup %1064  ;;  %v529_v51 = vmul.f32 1.442695, %v528_v49 }
 0x211   : > { %v421_v45 = vpack.c.bf16 %v1065_v44, %v1065_v44  ;;  %v418_v5 = vsel %vm392_vm1, %v1065_v44, 0.0 }
 0x213   : > { %959 = vmatmul.msk.bf16.vlgmr.msra.gmra.mxu2 %vm392_vm1, %v421_v45  ;;  %v471_v47 = vpop.xlane.xlu0 %470 }
 0x214   : > { %v472_v48 = vsub.f32 %v466_v33, %v471_v47 }
 0x216   : > { %v473_v50 = vmul.f32 1.442695, %v472_v48 }
 0x218   : > { %1066 = vpow2.f32 %v473_v50 }
 0x219   : > { %1068 = vpow2.f32 %v529_v51 }
 0x21e   : > { %v1067_v52 = vpop.eup %1066 }
 0x21f   : > { %v475_v53 = vsel %vm392_vm1, %v1067_v52, 0.0  ;;  %v478_v54 = vpack.c.bf16 %v1067_v52, %v1067_v52  ;;  %v1069_v56 = vpop.eup %1068 }
 0x220   : > { %476 = vadd.xlane.f32.xlu2 %v475_v53  ;;  %v531_v63 = vsel %vm392_vm1, %v1069_v56, 0.0  ;;  %v534_v0 = vpack.c.bf16 %v1069_v56, %v1069_v56 }
 0x223   : > { %v583_v55 = vpop.xlane.xlu2 %582  ;;  %961 = vmatmul.msk.bf16.vlgmr.msrb.gmra.mxu2 %vm392_vm1, %v478_v54  ;;  %v1022_v54 = vld [vmem:[%s1348_s4 + $0x8] sm:$0xff] }
 0x224   : > { %v584_v57 = vsub.f32 %v578_v38, %v583_v55  ;;  %v1021_v55 = vld [vmem:[%s1348_s4] sm:$0xff] }
 0x225   : > { %v536_v58 = vpop.permute.xlu1 %535 }
 0x226   : > { %v585_v59 = vmul.f32 1.442695, %v584_v57  ;;  %v592_v60 = vpop.permute.xlu0 %591  ;;  %v541_v61 = vsel %vm427_vm2, %v536_v58, 0 }
 0x227   : > { %v597_v62 = vsel %vm427_vm2, %v592_v60, 0  ;;  %550 = vmatpush.bf16.msrb.mxu1 %v541_v61 }
 0x228   : > { %1070 = vpow2.f32 %v585_v59  ;;  %532 = vadd.xlane.f32.xlu2 %v531_v63  ;;  %606 = vmatpush.bf16.msra.mxu2 %v597_v62 }
 0x22a   : > { %963 = vmatmul.msk.bf16.vlgmr.msrb.gmra.mxu1 %vm392_vm1, %v534_v0 }
 0x22b   : > { %718 = vmatpush.bf16.msra.mxu1 %v1022_v54 }
 0x22e   : > { %v1071_v1 = vpop.eup %1070 }
 0x22f   : > { %v587_v4 = vsel %vm392_vm1, %v1071_v1, 0.0  ;;  %v590_v6 = vpack.c.bf16 %v1071_v1, %v1071_v1  ;;  %719 = vmatpush.bf16.msra.mxu1 %v1021_v55  ;;  %v691_v1 = vperm.slane %v1234_v3, 3 }
 0x230   : > { %588 = vadd.xlane.f32.xlu0 %v587_v4  ;;  %419 = vadd.xlane.f32.xlu2 %v418_v5  ;;  %v693_v5 = vperm.slane %v1234_v3, 4 }
 0x233   : > { %965 = vmatmul.msk.bf16.vlgmr.msra.gmra.mxu2 %vm392_vm1, %v590_v6 }
 0x293   : > { %v477_v7 = vpop.xlane.xlu2 %476 }
 0x294   : > { %1072 = vrcp.f32 %v477_v7 }
 0x296   : > { %v440_v8 = vpop.f32.mrf.mxu2 }
 0x29a   : > { %v1073_v11 = vpop.eup %1072 }
 0x29b   : > { %v533_v9 = vpop.xlane.xlu2 %532 }
 0x29c   : > { %1074 = vrcp.f32 %v533_v9 }
 0x29e   : > { %v442_v10 = vpop.f32.mrf.mxu2 }
 0x29f   : > { %v696_v10 = vperm.slane %v1234_v3, 1 }
 0x2a2   : > { %v1075_v13 = vpop.eup %1074 }
 0x2a3   : > { %v589_v17 = vpop.xlane.xlu0 %588  ;;  %v420_v26 = vpop.xlane.xlu2 %419 }
 0x2a4   : > { %1076 = vrcp.f32 %v589_v17 }
 0x2a5   : > { %1078 = vrcp.f32 %v420_v26 }
 0x2a6   : > { %v496_v12 = vpop.f32.mrf.mxu2  ;;  %1080 = vrcp.f32 %v1146_v43 }
 0x2a7   : > { %v501_v14 = vmul.f32 %v1073_v11, %v496_v12  ;;  %v552_v15 = vpop.f32.mrf.mxu1 }
 0x2a8   : > { %v557_v16 = vmul.f32 %v1075_v13, %v552_v15 }
 0x2a9   : > { %615 = vrot.lane.b32.xlu1 %v501_v14, %s1143_s19 }
 0x2aa   : > { %619 = vrot.lane.b32.xlu2 %v557_v16, %s1144_s20  ;;  %v1077_v20 = vpop.eup %1076 }
 0x2ab   : > { %v1079_v27 = vpop.eup %1078 }
 0x2ac   : > { %v445_v29 = vmul.f32 %v1079_v27, %v440_v8  ;;  %v1081_v44 = vpop.eup %1080  ;;  %v1023_v27 = vld [vmem:[%s1349_s5] sm:$0xff] }
 0x2ad   : > { %v666_v45 = vmul.f32 32.0, %v1081_v44  ;;  %vm670_vm5 = vweird.f32 %v1081_v44 }
 0x2ae   : > { %v498_v18 = vpop.f32.mrf.mxu2 }
 0x2af   : > { %v554_v19 = vpop.f32.mrf.mxu1  ;;  %v667_v46 = vsub.f32 1.0, %v666_v45  ;;  %v1026_v18 = vld [vmem:[%s1349_s5 + $0x18] sm:$0xff] }
 0x2b0   : > { %799 = vmatpush.bf16.msra.mxu3 %v1026_v18  ;;  %v1025_v19 = vld [vmem:[%s1349_s5 + $0x10] sm:$0xff] }
 0x2b1   : > { %v668_v47 = vmul.f32 %v1081_v44, %v667_v46 }
 0x2b3   : > { %v669_v48 = vadd.f32 %v1081_v44, %v668_v47 }
 0x2b4   : > { %800 = vmatpush.bf16.msra.mxu3 %v1025_v19 }
 0x2b5   : > { %v1291_v49 = vsel %vm670_vm5, %v1081_v44, %v669_v48 }
 0x2b6   : > { %v608_v21 = vpop.f32.mrf.mxu2 }
 0x2b7   : > { %v613_v22 = vmul.f32 %v1077_v20, %v608_v21 }
 0x2b9   : > { %623 = vrot.lane.b32.xlu1 %v613_v22, %s1145_s21  ;;  %v1024_v22 = vld [vmem:[%s1349_s5 + $0x8] sm:$0xff] }
 0x2ba   : > { %801 = vmatpush.bf16.msra.mxu3 %v1024_v22 }
 0x2be   : > { %v610_v23 = vpop.f32.mrf.mxu2  ;;  %802 = vmatpush.bf16.msra.mxu3 %v1023_v27 }
 0x304   : > { %v620_v31 = vpop.permute.xlu2 %619 }
 0x31b   : > { %v616_v28 = vpop.permute.xlu1 %615 }
 0x31c   : > { %v626_v30 = vsel %vm392_vm1, %v445_v29, %v616_v28 }
 0x31d   : > { %v628_v32 = vsel %vm627_vm3, %v626_v30, %v620_v31 }
 0x32b   : > { %v624_v33 = vpop.permute.xlu1 %623 }
 0x32c   : > { %v630_v34 = vsel %vm629_vm4, %v628_v32, %v624_v33 }
 0x32d   : > { %v631_v35 = vpack.c.bf16 %v630_v34, %v630_v34 }
 0x32f   : > { %974 = vmatmul.msk.bf16.vlgmr.msra.gmra.mxu0 %vm368_vm0, %v631_v35 }
 0x3ac   : > { %v657_v38 = vpop.f32.mrf.mxu0 }
 0x3ad   : > { %v658_v39 = vadd.f32 %v657_v38, %v632_v36 }
 0x3af   : > { %v661_v40 = vadd.f32 %v658_v39, %v354_v37 }
 0x3b1   : > { %v662_v41 = vsel %vm368_vm0, %v661_v40, 0.0 }
 0x3b2   : > { %663 = vadd.xlane.f32.xlu1 %v662_v41 }
 0x3b4   : > { %v659_v42 = vpop.f32.mrf.mxu0 }
 0x425   : > { %v664_v50 = vpop.xlane.xlu1 %663 }
 0x426   : > { %v672_v2 = vmul.f32 %v1291_v49, %v664_v50 }
 0x428   : > { %v673_v51 = vsub.f32 %v661_v40, %v672_v2 }
 0x42a   : > { %v674_v52 = vmul.f32 %v673_v51, %v673_v51 }
 0x42c   : > { %v675_v53 = vsel %vm368_vm0, %v674_v52, 0.0 }
 0x42d   : > { %676 = vadd.xlane.f32.xlu2 %v675_v53  ;;  %v766_v53 = vperm.slane %v1234_v3, 5 }
 0x4a0   : > { %v677_v56 = vpop.xlane.xlu2 %676 }
 0x4a1   : > { %v678_v57 = vmul.f32 %v677_v56, %v1291_v49 }
 0x4a3   : > { %v679_v58 = vadd.f32 1e-07, %v678_v57 }
 0x4a5   : > { %1082 = vrsqrt.f32 %v679_v58  ;;  %vm686_vm7 = vweird.f32 %v679_v58 }
 0x4ab   : > { %v1083_v59 = vpop.eup %1082 }
 0x4ac   : > { %v681_v60 = vmul.f32 %v1083_v59, %v679_v58  ;;  %vm687_vm6 = vweird.f32 %v1083_v59 }
 0x4ad   : > { %vm688_vm8 = vmor %vm686_vm7, %vm687_vm6 }
 0x4ae   : > { %v682_v61 = vmul.f32 %v1083_v59, %v681_v60 }
 0x4b0   : > { %v683_v62 = vmul.f32 0.5, %v682_v61 }
 0x4b2   : > { %v684_v63 = vsub.f32 1.5, %v683_v62 }
 0x4b4   : > { %v685_v0 = vmul.f32 %v1083_v59, %v684_v63 }
 0x4b6   : > { %v689_v4 = vsel %vm688_vm8, %v1083_v59, %v685_v0 }
 0x4b7   : > { %v690_v6 = vmul.f32 %v689_v4, %v673_v51 }
 0x4b9   : > { %v692_v7 = vmul.f32 %v691_v1, %v690_v6  ;;  %v1028_v1 = vld [vmem:[%s1351_s7 + $0x8] sm:$0xff] }
 0x4ba   : > { %877 = vmatpush.bf16.msrb.mxu2 %v1028_v1 }
 0x4bb   : > { %v694_v8 = vadd.f32 %v693_v5, %v692_v7  ;;  %v1027_v5 = vld [vmem:[%s1351_s7] sm:$0xff] }
 0x4bd   : > { %v695_v9 = vpack.c.bf16 %v694_v8, %v694_v8 }
 0x4be   : > { %878 = vmatpush.bf16.msrb.mxu2 %v1027_v5 }
 0x4bf   : > { %983 = vmatmul.msk.bf16.vlgmr.msra.gmra.mxu1 %vm368_vm0, %v695_v9 }
 0x53c   : > { %v721_v11 = vpop.f32.mrf.mxu1 }
 0x53d   : > { %v722_v12 = vadd.f32 %v721_v11, %v696_v10  ;;  %v1147_v10 = vmov 8.0  }
 0x53f   : > { %v726_v13 = vmul.f32 0.70710677, %v722_v12  ;;  %v725_v50 = vmul.f32 0.5, %v722_v12 }
 0x541   : > { %v727_v14 = vand.u32 2147483647, %v726_v13  ;;  %vm760_vm13 = vcmp.lt.f32.partialorder %v726_v13, 0.0 }
 0x543   : > { %v728_v15 = vmul.f32 0.3275911, %v727_v14  ;;  %v754_v32 = vsub.f32 0.0, %v727_v14 }
 0x544   : > { %v723_v16 = vpop.f32.mrf.mxu1 }
 0x545   : > { %v729_v17 = vadd.f32 1.0, %v728_v15  ;;  %v755_v35 = vmul.f32 %v754_v32, %v727_v14  ;;  %v833_v16 = vperm.slane %v1234_v3, 7 }
 0x547   : > { %1084 = vrcp.f32 %v729_v17  ;;  %v741_v24 = vand.u32 2147483648, %v729_v17  ;;  %v739_v26 = vand.u32 2147483647, %v729_v17  ;;  %vm735_vm10 = vweird.f32 %v729_v17 }
 0x548   : > { %v756_v38 = vmul.f32 1.442695, %v755_v35 }
 0x549   : > { %v742_v29 = vor.u32 1.1754944e-38, %v741_v24  ;;  %vm740_vm12 = vcmp.eq.f32.partialorder %v739_v26, 8.507059e+37 }
 0x54a   : > { %1086 = vpow2.f32 %v756_v38 }
 0x54d   : > { %v1085_v20 = vpop.eup %1084 }
 0x54e   : > { %v731_v21 = vmul.f32 %v1085_v20, %v729_v17  ;;  %vm736_vm9 = vweird.f32 %v1085_v20 }
 0x54f   : > { %vm737_vm11 = vmor %vm735_vm10, %vm736_vm9 }
 0x550   : > { %v732_v23 = vsub.f32 1.0, %v731_v21  ;;  %v1087_v44 = vpop.eup %1086 }
 0x552   : > { %v733_v25 = vmul.f32 %v1085_v20, %v732_v23 }
 0x554   : > { %v734_v28 = vadd.f32 %v1085_v20, %v733_v25 }
 0x556   : > { %v738_v30 = vsel %vm737_vm11, %v1085_v20, %v734_v28 }
 0x557   : > { %v743_v31 = vsel %vm740_vm12, %v742_v29, %v738_v30 }
 0x558   : > { %v745_v33 = vmul.f32 1.0614054, %v743_v31 }
 0x55a   : > { %v984_v34 = vadd.f32 -1.4531521, %v745_v33  ;;  %v855_v33 = vld [vmem:[%s1352_s8] sm:$0x1] }
 0x55c   : > { %v747_v36 = vmul.f32 %v984_v34, %v743_v31 }
 0x55e   : > { %v748_v37 = vadd.f32 1.4214138, %v747_v36 }
 0x560   : > { %v749_v39 = vmul.f32 %v748_v37, %v743_v31 }
 0x562   : > { %v985_v40 = vadd.f32 -0.28449672, %v749_v39 }
 0x564   : > { %v751_v41 = vmul.f32 %v985_v40, %v743_v31 }
 0x566   : > { %v752_v42 = vadd.f32 0.2548296, %v751_v41 }
 0x568   : > { %v753_v43 = vmul.f32 %v752_v42, %v743_v31 }
 0x56a   : > { %v758_v45 = vmul.f32 %v1087_v44, %v753_v43 }
 0x56c   : > { %v759_v46 = vsub.f32 1.0, %v758_v45 }
 0x56e   : > { %v761_v47 = vsub.f32 0.0, %v759_v46 }
 0x570   : > { %v762_v48 = vsel %vm760_vm13, %v761_v47, %v759_v46 }
 0x571   : > { %v763_v2 = vadd.f32 1.0, %v762_v48 }
 0x573   : > { %v764_v51 = vmul.f32 %v763_v2, %v725_v50 }
 0x575   : > { %v765_v52 = vpack.c.bf16 %v764_v51, %v764_v51 }
 0x577   : > { %1002 = vmatmul.msk.bf16.vlgmr.msra.gmra.mxu3 %vm791_vm14, %v765_v52 }
 0x5fa   : > { %v804_v54 = vpop.f32.mrf.mxu3 }
 0x5fb   : > { %v805_v55 = vadd.f32 %v804_v54, %v766_v53 }
 0x5fd   : > { %v808_v56 = vadd.f32 %v805_v55, %v694_v8 }
 0x5ff   : > { %v809_v57 = vsel %vm368_vm0, %v808_v56, 0.0 }
 0x600   : > { %810 = vadd.xlane.f32.xlu0 %v809_v57 }
 0x602   : > { %v806_v58 = vpop.f32.mrf.mxu3 }
 0x673   : > { %v811_v59 = vpop.xlane.xlu0 %810 }
 0x674   : > { %v812_v60 = vmul.f32 %v811_v59, %v1291_v49 }
 0x676   : > { %v813_v61 = vsub.f32 %v808_v56, %v812_v60 }
 0x678   : > { %v814_v62 = vmul.f32 %v813_v61, %v813_v61 }
 0x67a   : > { %v815_v63 = vsel %vm368_vm0, %v814_v62, 0.0 }
 0x67b   : > { %816 = vadd.xlane.f32.xlu0 %v815_v63 }
 0x6ee   : > { %v817_v0 = vpop.xlane.xlu0 %816 }
 0x6ef   : > { %v818_v4 = vmul.f32 %v817_v0, %v1291_v49  ;;  %v831_v49 = vperm.slane %v1234_v3, 6 }
 0x6f1   : > { %v819_v6 = vadd.f32 1e-07, %v818_v4 }
 0x6f3   : > { %1088 = vrsqrt.f32 %v819_v6  ;;  %vm826_vm1 = vweird.f32 %v819_v6 }
 0x6f4   : > { %1090 = vrcp.f32 %v1147_v10 }
 0x6f9   : > { %v1089_v7 = vpop.eup %1088 }
 0x6fa   : > { %v821_v8 = vmul.f32 %v1089_v7, %v819_v6  ;;  %vm827_vm15 = vweird.f32 %v1089_v7  ;;  %v1091_v13 = vpop.eup %1090 }
 0x6fb   : > { %vm828_vm2 = vmor %vm826_vm1, %vm827_vm15  ;;  %v843_v18 = vmul.f32 8.0, %v1091_v13  ;;  %vm847_vm3 = vweird.f32 %v1091_v13 }
 0x6fc   : > { %v822_v9 = vmul.f32 %v1089_v7, %v821_v8 }
 0x6fd   : > { %v844_v21 = vsub.f32 1.0, %v843_v18 }
 0x6fe   : > { %v823_v11 = vmul.f32 0.5, %v822_v9 }
 0x6ff   : > { %v845_v24 = vmul.f32 %v1091_v13, %v844_v21 }
 0x700   : > { %v824_v12 = vsub.f32 1.5, %v823_v11 }
 0x701   : > { %v846_v27 = vadd.f32 %v1091_v13, %v845_v24 }
 0x702   : > { %v825_v14 = vmul.f32 %v1089_v7, %v824_v12 }
 0x703   : > { %v848_v30 = vsel %vm847_vm3, %v1091_v13, %v846_v27 }
 0x704   : > { %v829_v15 = vsel %vm828_vm2, %v1089_v7, %v825_v14 }
 0x705   : > { %v830_v17 = vmul.f32 %v829_v15, %v813_v61 }
 0x707   : > { %v832_v19 = vmul.f32 %v831_v49, %v830_v17 }
 0x709   : > { %v834_v20 = vadd.f32 %v833_v16, %v832_v19 }
 0x70b   : > { %v835_v22 = vsel %vm368_vm0, %v834_v20, 0.0 }
 0x70c   : > { %v836_v23 = vrot.slane %v835_v22, 4 }
 0x70e   : > { %v837_v25 = vadd.f32 %v836_v23, %v835_v22 }
 0x710   : > { %v838_v26 = vrot.slane %v837_v25, 2 }
 0x712   : > { %v839_v28 = vadd.f32 %v838_v26, %v837_v25 }
 0x714   : > { %v840_v29 = vrot.slane %v839_v28, 1 }
 0x716   : > { %v841_v31 = vadd.f32 %v840_v29, %v839_v28 }
 0x718   : > { %v849_v3 = vmul.f32 %v848_v30, %v841_v31 }
 0x71a   : > { %v850_v32 = vpack.c.bf16 %v849_v3, %v849_v3 }
 0x71c   : > { %1011 = vmatmul.msk.bf16.vlgmr.msrb.gmra.mxu2 %vm368_vm0, %v850_v32 }
 0x79f   : > { %v880_v34 = vpop.f32.mrf.mxu2 }
 0x7a0   : > { %v881_v35 = vadd.f32 %v880_v34, %v855_v33 }
 0x7a2   : > { %1031 = vst [vmem:[%s1029_s11 - $0x1] sm:$0x1] %v881_v35 }
 0x7a3   : > { %1033 = dma.vmem_to_hbm [thread:$0]  (%p1036_p4), %s893_s26, 32, %s895_s29, [#allocation3]  }
 0x7a7   : > { %v882_v36 = vpop.f32.mrf.mxu2 }
 0x7a8   : > { %1125 = dma.done.wait (%p1036_p4), [#allocation3], 32  }
 0x7a9   : > { %1127 = vsyncadd (%p1036_p4), [#allocation3], 4294967264 }
 0x7aa PF: > { %s20_s30 = sadd.s32 1, %s1130_s30  }
 0x7ab   : > { %p17_p5 = scmp.ge.s32.totalorder %s20_s30, 4  }
 0x7ad   :  { %19 = sbr.rel (!%p17_p5) target bundleno = 1 (0x1), region = 87 }
 0x7b2   :  { %908 = vsyncpa [#allocation3], 1 }
 0x7b3   :  { %910 = vsyncpa [#allocation3 + $0x1], 1 }

// kernel: toxic_model_forward.2
= control target key start
LH: loop header
LB: loop body
LE: loop exit
PB: predicated region body
PF: predicated region fallthrough
CT: control target
= control target key end

     0   :  { %s1074_s24 = smov 0   ;;  %s1214_s0 = inlined_call_operand.vmem [shape: bf16[16,32], index: 0, kind: input, shape index: {}]   ;;  %s1215_s1 = inlined_call_operand.vmem [shape: f32[2,1,8], index: 1, kind: input, shape index: {}]   ;;  %s1216_s2 = inlined_call_operand.vmem [shape: bf16[32,96], index: 2, kind: input, shape index: {}]   ;;  %s1217_s3 = inlined_call_operand.vmem [shape: bf16[32,32], index: 3, kind: input, shape index: {}]   ;;  %s1218_s4 = inlined_call_operand.vmem [shape: bf16[32,64], index: 4, kind: input, shape index: {}]   ;;  %s1219_s5 = inlined_call_operand.vmem [shape: bf16[64,32], index: 5, kind: input, shape index: {}]   ;;  %s1220_s6 = inlined_call_operand.vmem [shape: f32[10,96], index: 6, kind: input, shape index: {}]   ;;  %s1221_s7 = inlined_call_operand.vmem [shape: bf16[16,32], index: 7, kind: output, shape index: {}]  }
   0x1 LB: > { %s886_s25 = sadd.s32 4294967295, %s1017_s24   ;;  %p890_p0 = scmp.ge.s32.totalorder %s1017_s24, 1  ;;  %s1017_s24 = sphi %s1074_s24, %s17_s24  }
   0x2   : > { %p244_p1 = scmp.lt.s32.totalorder %s1017_s24, 3 }
   0x4   : > { %p245_p2 = pnand %p890_p0, %p244_p1 }
   0x5   : > { %p277_p3 = scmp.lt.s32.totalorder (!%p245_p2), %s886_s25, 1  ;;  %s1020_s18 = smov (!%p245_p2), 104  }
   0x6   : > { %248 = sbr.rel (%p245_p2) target bundleno = 2083 (0x823), region = 48  ;;  %s1021_s19 = smov (!%p245_p2), 120  }
   0x7   : > { %s1022_s20 = smov (!%p245_p2), 96   ;;  %s1023_s21 = smov (!%p245_p2), 56  }
   0x8   : > { %s1024_s22 = smov (!%p245_p2), 72   ;;  %s1025_s23 = smov (!%p245_p2), 88  }
   0x9   : > { %s1026_s27 = smov (!%p245_p2), 112   ;;  %s1027_s28 = smov (!%p245_p2), 80  }
   0xa   : > { %s1028_s30 = smov (!%p245_p2), 64   ;;  %s1030_s10 = smov (!%p245_p2), 48  }
   0xb   : > { %s1223_s25 = smov (!%p277_p3, %s886_s25), 1  ;;  %vm314_vm0 = vcmask 261120   ;;  %v1019_v3 = vmov 32.0   ;;  %v950_v15 = vld [vmem:[%s1216_s2 + $0x8] sm:$0xff]  ;;  %v949_v16 = vld [vmem:[%s1216_s2] sm:$0xff]  ;;  %vm420_vm5 = vcmask 1043456  }
   0xc   : > { %s891_s26 = sshll.u32 %s1223_s25, 2  ;;  %s283_s29 = scalar_lea.vmem %s1215_s1, %s1223_s25  ;;  %983 = vrcp.f32 %v1019_v3  ;;  %371 = vmatpush.bf16.msra.mxu0 %v950_v15  ;;  %v312_v25 = vld [vmem:[%s1220_s6 + $0x8] sm:$0x3]  ;;  %v1117_v34 = vld [vmem:[%s1220_s6] sm:$0xff]  ;;  %vm385_vm6 = vcmask 64512   ;;  %vm620_vm7 = vcmask 130048  }
   0xd   : > { %s280_s9 = scalar_lea.vmem %s1214_s0, %s891_s26  ;;  %v344_v27 = vperm.slane %v312_v25, 0  ;;  %v346_v30 = vperm.slane %v312_v25, 1  ;;  %v349_v35 = vperm.slane %v1117_v34, 0  ;;  %v982_v55 = vld [vmem:[%s283_s29] ss:$0 sm:$0xff]  ;;  %s1029_s29 = smov 40  }
   0xe   : > { %v289_v0 = vld [vmem:[%s280_s9] sm:$0xf]  ;;  %s1031_s11 = smov 16   ;;  %s1032_s12 = smov 8   ;;  %vm622_vm8 = vcmask 195584  }
   0xf   : > { %v313_v1 = vunpack.c.l.bf16 %v289_v0  ;;  %s1033_s13 = smov 24  }
  0x10   : > { %372 = vmatpush.bf16.msra.mxu0 %v949_v16 }
  0x11   : > { %v315_v2 = vsel %vm314_vm0, %v313_v1, 0.0 }
  0x12   : > { %316 = vadd.xlane.f32.xlu0 %v315_v2  ;;  %v984_v4 = vpop.eup %983 }
  0x13   : > { %v319_v5 = vmul.f32 32.0, %v984_v4  ;;  %vm323_vm1 = vweird.f32 %v984_v4 }
  0x15   : > { %v320_v6 = vsub.f32 1.0, %v319_v5 }
  0x17   : > { %v321_v7 = vmul.f32 %v984_v4, %v320_v6 }
  0x19   : > { %v322_v8 = vadd.f32 %v984_v4, %v321_v7 }
  0x1b   : > { %v1095_v9 = vsel %vm323_vm1, %v984_v4, %v322_v8 }
  0x85   : > { %v317_v10 = vpop.xlane.xlu0 %316 }
  0x86   : > { %v325_v11 = vmul.f32 %v1095_v9, %v317_v10 }
  0x88   : > { %v326_v12 = vsub.f32 %v313_v1, %v325_v11 }
  0x8a   : > { %v327_v13 = vmul.f32 %v326_v12, %v326_v12 }
  0x8c   : > { %v328_v14 = vsel %vm314_vm0, %v327_v13, 0.0 }
  0x8d   : > { %329 = vadd.xlane.f32.xlu0 %v328_v14 }
 0x100   : > { %v330_v17 = vpop.xlane.xlu0 %329 }
 0x101   : > { %v331_v18 = vmul.f32 %v330_v17, %v1095_v9 }
 0x103   : > { %v332_v19 = vadd.f32 1e-07, %v331_v18 }
 0x105   : > { %985 = vrsqrt.f32 %v332_v19  ;;  %vm339_vm3 = vweird.f32 %v332_v19 }
 0x10b   : > { %v986_v20 = vpop.eup %985 }
 0x10c   : > { %v334_v21 = vmul.f32 %v986_v20, %v332_v19  ;;  %vm340_vm2 = vweird.f32 %v986_v20 }
 0x10d   : > { %vm341_vm4 = vmor %vm339_vm3, %vm340_vm2  ;;  %vm777_vm2 = vcmask 523264  }
 0x10e   : > { %v335_v22 = vmul.f32 %v986_v20, %v334_v21 }
 0x110   : > { %v336_v23 = vmul.f32 0.5, %v335_v22 }
 0x112   : > { %v337_v24 = vsub.f32 1.5, %v336_v23 }
 0x114   : > { %v338_v26 = vmul.f32 %v986_v20, %v337_v24 }
 0x116   : > { %v342_v28 = vsel %vm341_vm4, %v986_v20, %v338_v26 }
 0x117   : > { %v343_v29 = vmul.f32 %v342_v28, %v326_v12 }
 0x119   : > { %v345_v31 = vmul.f32 %v344_v27, %v343_v29 }
 0x11b   : > { %v1109_v32 = vadd.f32 %v346_v30, %v345_v31 }
 0x11d   : > { %v348_v33 = vpack.c.bf16 %v1109_v32, %v1109_v32 }
 0x11f   : > { %901 = vmatmul.msk.bf16.vlgmr.msra.gmra.mxu0 %vm314_vm0, %v348_v33 }
 0x19c   : > { %v374_v36 = vpop.f32.mrf.mxu0 }
 0x19d   : > { %v375_v37 = vadd.f32 %v374_v36, %v349_v35 }
 0x19f   : > { %v1120_v38 = vpack.c.bf16 %v375_v37, %v375_v37 }
 0x1a1   : > { %551 = vrot.lane.b32.xlu0 %v1120_v38, %s1020_s18  ;;  %439 = vrot.lane.b32.xlu2 %v1120_v38, %s1021_s19 }
 0x1a2   : > { %383 = vrot.lane.b32.xlu1 %v1120_v38, %s1022_s20 }
 0x1a4   : > { %v376_v39 = vpop.f32.mrf.mxu0 }
 0x1a9   : > { %472 = vrot.lane.b32.xlu0 %v1120_v38, %s1023_s21  ;;  %553 = vrot.lane.b32.xlu2 %v1120_v38, %s1024_s22 }
 0x1aa   : > { %441 = vrot.lane.b32.xlu1 %v1120_v38, %s1025_s23 }
 0x1b1   : > { %495 = vrot.lane.b32.xlu2 %v1120_v38, %s1026_s27 }
 0x1b2   : > { %497 = vrot.lane.b32.xlu1 %v1120_v38, %s1027_s28 }
 0x1b9   : > { %415 = vrot.lane.b32.xlu2 %v1120_v38, %s1028_s30 }
 0x1fb   : > { %v440_v40 = vpop.permute.xlu2 %439 }
 0x203   : > { %v554_v41 = vpop.permute.xlu2 %553 }
 0x204   : > { %v559_v52 = vsel %vm385_vm6, %v554_v41, 0 }
 0x20b   : > { %v496_v42 = vpop.permute.xlu2 %495 }
 0x213   : > { %v552_v43 = vpop.permute.xlu0 %551  ;;  %v416_v44 = vpop.permute.xlu2 %415 }
 0x214   : > { %v384_v45 = vpop.permute.xlu1 %383  ;;  %v422_v46 = vsel %vm420_vm5, %v416_v44, 0 }
 0x215   : > { %v390_v47 = vsel %vm385_vm6, %v384_v45, 0  ;;  %431 = vmatpush.bf16.msra.mxu2 %v422_v46 }
 0x216   : > { %399 = vmatpush.bf16.xpose.msra.mxu1 %v390_v47 }
 0x21b   : > { %v473_v48 = vpop.permute.xlu0 %472 }
 0x21c   : > { %v442_v49 = vpop.permute.xlu1 %441  ;;  %v478_v50 = vsel %vm420_vm5, %v473_v48, 0 }
 0x21d   : > { %902 = vmatmul.msk.bf16.vlgmr.msra.gmra.mxu1 %vm385_vm6, %v1120_v38  ;;  %v447_v51 = vsel %vm385_vm6, %v442_v49, 0  ;;  %487 = vmatpush.bf16.msrb.mxu2 %v478_v50 }
 0x21e   : > { %456 = vmatpush.bf16.xpose.msra.mxu3 %v447_v51 }
 0x224   : > { %v498_v53 = vpop.permute.xlu1 %497 }
 0x225   : > { %904 = vmatmul.msk.bf16.vlgmr.msra.gmra.mxu3 %vm385_vm6, %v440_v40  ;;  %v503_v54 = vsel %vm385_vm6, %v498_v53, 0 }
 0x226   : > { %568 = vmatpush.bf16.xpose.msrb.mxu3 %v559_v52  ;;  %512 = vmatpush.bf16.xpose.msrb.mxu0 %v503_v54 }
 0x22d   : > { %906 = vmatmul.msk.bf16.vlgmr.msrb.gmra.mxu0 %vm385_vm6, %v496_v42 }
 0x235   : > { %908 = vmatmul.msk.bf16.vlgmr.msrb.gmra.mxu3 %vm385_vm6, %v552_v43 }
 0x29a   : > { %v401_v56 = vpop.f32.mrf.mxu1 }
 0x29b   : > { %v402_v57 = vadd.f32 %v982_v55, %v401_v56  ;;  %v952_v56 = vld [vmem:[%s1217_s3 + $0x8] sm:$0xff] }
 0x29c   : > { %647 = vmatpush.bf16.msra.mxu0 %v952_v56 }
 0x29d   : > { %v405_v58 = vsel %vm385_vm6, %v402_v57, -inf }
 0x29e   : > { %406 = vmax.xlane.f32.xlu1 %v405_v58 }
 0x2a2   : > { %v403_v59 = vpop.f32.mrf.mxu1 }
 0x2a8   : > { %v458_v60 = vpop.f32.mrf.mxu3 }
 0x2a9   : > { %v459_v61 = vadd.f32 %v982_v55, %v458_v60 }
 0x2aa   : > { %v514_v62 = vpop.f32.mrf.mxu0 }
 0x2ab   : > { %v515_v63 = vadd.f32 %v982_v55, %v514_v62  ;;  %v462_v0 = vsel %vm385_vm6, %v459_v61, -inf }
 0x2ac   : > { %463 = vmax.xlane.f32.xlu2 %v462_v0 }
 0x2ad   : > { %v518_v1 = vsel %vm385_vm6, %v515_v63, -inf }
 0x2ae   : > { %519 = vmax.xlane.f32.xlu1 %v518_v1 }
 0x2b0   : > { %v460_v2 = vpop.f32.mrf.mxu3 }
 0x2b2   : > { %v516_v3 = vpop.f32.mrf.mxu0 }
 0x2b8   : > { %v570_v4 = vpop.f32.mrf.mxu3 }
 0x2b9   : > { %v571_v5 = vadd.f32 %v982_v55, %v570_v4  ;;  %v625_v4 = vperm.slane %v1117_v34, 2 }
 0x2bb   : > { %v574_v6 = vsel %vm385_vm6, %v571_v5, -inf }
 0x2bc   : > { %575 = vmax.xlane.f32.xlu0 %v574_v6 }
 0x2c0   : > { %v572_v7 = vpop.f32.mrf.mxu3 }
 0x2c4   : > { %584 = vrot.lane.b32.xlu2 %v1120_v38, %s1029_s29 }
 0x2c7   : > { %528 = vrot.lane.b32.xlu1 %v1120_v38, %s1030_s10 }
 0x311   : > { %v407_v8 = vpop.xlane.xlu1 %406 }
 0x312   : > { %v408_v10 = vsub.f32 %v402_v57, %v407_v8  ;;  %v951_v57 = vld [vmem:[%s1217_s3] sm:$0xff] }
 0x313   : > { %648 = vmatpush.bf16.msra.mxu0 %v951_v57 }
 0x314   : > { %v409_v11 = vmul.f32 1.442695, %v408_v10 }
 0x316   : > { %987 = vpow2.f32 %v409_v11 }
 0x31c   : > { %v988_v12 = vpop.eup %987 }
 0x31d   : > { %v411_v13 = vsel %vm385_vm6, %v988_v12, 0.0  ;;  %v414_v14 = vpack.c.bf16 %v988_v12, %v988_v12 }
 0x31e   : > { %412 = vadd.xlane.f32.xlu1 %v411_v13 }
 0x31f   : > { %v464_v15 = vpop.xlane.xlu2 %463  ;;  %903 = vmatmul.msk.bf16.vlgmr.msra.gmra.mxu2 %vm385_vm6, %v414_v14 }
 0x320   : > { %v465_v16 = vsub.f32 %v459_v61, %v464_v15 }
 0x321   : > { %v520_v17 = vpop.xlane.xlu1 %519 }
 0x322   : > { %v466_v18 = vmul.f32 1.442695, %v465_v16  ;;  %v521_v19 = vsub.f32 %v515_v63, %v520_v17  ;;  %v954_v16 = vld [vmem:[%s1218_s4 + $0x8] sm:$0xff] }
 0x324   : > { %989 = vpow2.f32 %v466_v18  ;;  %v522_v20 = vmul.f32 1.442695, %v521_v19 }
 0x326   : > { %991 = vpow2.f32 %v522_v20 }
 0x327   : > { %v585_v21 = vpop.permute.xlu2 %584 }
 0x328   : > { %v590_v22 = vsel %vm420_vm5, %v585_v21, 0 }
 0x329   : > { %599 = vmatpush.bf16.msra.mxu2 %v590_v22 }
 0x32a   : > { %v990_v23 = vpop.eup %989 }
 0x32b   : > { %v471_v26 = vpack.c.bf16 %v990_v23, %v990_v23  ;;  %v468_v30 = vsel %vm385_vm6, %v990_v23, 0.0 }
 0x32c   : > { %v992_v24 = vpop.eup %991 }
 0x32d   : > { %v524_v25 = vsel %vm385_vm6, %v992_v24, 0.0  ;;  %v527_v37 = vpack.c.bf16 %v992_v24, %v992_v24 }
 0x32e   : > { %525 = vadd.xlane.f32.xlu0 %v524_v25 }
 0x32f   : > { %v576_v27 = vpop.xlane.xlu0 %575  ;;  %905 = vmatmul.msk.bf16.vlgmr.msrb.gmra.mxu2 %vm385_vm6, %v471_v26  ;;  %v677_v26 = vperm.slane %v1117_v34, 3 }
 0x330   : > { %v577_v28 = vsub.f32 %v571_v5, %v576_v27 }
 0x332   : > { %v578_v29 = vmul.f32 1.442695, %v577_v28  ;;  %v679_v28 = vperm.slane %v1117_v34, 4 }
 0x334   : > { %993 = vpow2.f32 %v578_v29 }
 0x336   : > { %469 = vadd.xlane.f32.xlu0 %v468_v30 }
 0x339   : > { %v529_v31 = vpop.permute.xlu1 %528 }
 0x33a   : > { %v994_v33 = vpop.eup %993  ;;  %v534_v35 = vsel %vm420_vm5, %v529_v31, 0 }
 0x33b   : > { %543 = vmatpush.bf16.msrb.mxu1 %v534_v35  ;;  %v580_v36 = vsel %vm385_vm6, %v994_v33, 0.0  ;;  %v583_v38 = vpack.c.bf16 %v994_v33, %v994_v33  ;;  %v682_v35 = vperm.slane %v1117_v34, 1 }
 0x33c   : > { %581 = vadd.xlane.f32.xlu2 %v580_v36 }
 0x33e   : > { %907 = vmatmul.msk.bf16.vlgmr.msrb.gmra.mxu1 %vm385_vm6, %v527_v37 }
 0x33f   : > { %909 = vmatmul.msk.bf16.vlgmr.msra.gmra.mxu2 %vm385_vm6, %v583_v38  ;;  %704 = vmatpush.bf16.msra.mxu1 %v954_v16 }
 0x391   : > { %v413_v59 = vpop.xlane.xlu1 %412 }
 0x3a1   : > { %v526_v41 = vpop.xlane.xlu0 %525 }
 0x3a2   : > { %v433_v39 = vpop.f32.mrf.mxu2  ;;  %995 = vrcp.f32 %v526_v41 }
 0x3a8   : > { %v996_v45 = vpop.eup %995 }
 0x3a9   : > { %v470_v43 = vpop.xlane.xlu0 %469 }
 0x3aa   : > { %v435_v40 = vpop.f32.mrf.mxu2  ;;  %997 = vrcp.f32 %v470_v43  ;;  %v958_v43 = vld [vmem:[%s1219_s5 + $0x18] sm:$0xff] }
 0x3ab   : > { %785 = vmatpush.bf16.msra.mxu3 %v958_v43 }
 0x3af   : > { %v582_v48 = vpop.xlane.xlu2 %581 }
 0x3b0   : > { %v998_v50 = vpop.eup %997  ;;  %999 = vrcp.f32 %v582_v48 }
 0x3b1   : > { %1001 = vrcp.f32 %v413_v59 }
 0x3b2   : > { %v489_v42 = vpop.f32.mrf.mxu2 }
 0x3b3   : > { %v494_v52 = vmul.f32 %v998_v50, %v489_v42 }
 0x3b6   : > { %v1000_v54 = vpop.eup %999 }
 0x3b7   : > { %v1002_v61 = vpop.eup %1001 }
 0x3b8   : > { %v438_v62 = vmul.f32 %v1002_v61, %v433_v39 }
 0x3ba   : > { %v491_v44 = vpop.f32.mrf.mxu2 }
 0x3bb   : > { %v545_v46 = vpop.f32.mrf.mxu1  ;;  %v957_v44 = vld [vmem:[%s1219_s5 + $0x10] sm:$0xff] }
 0x3bc   : > { %v550_v47 = vmul.f32 %v996_v45, %v545_v46  ;;  %786 = vmatpush.bf16.msra.mxu3 %v957_v44 }
 0x3be   : > { %612 = vrot.lane.b32.xlu0 %v550_v47, %s1031_s11  ;;  %v956_v47 = vld [vmem:[%s1219_s5 + $0x8] sm:$0xff] }
 0x3c0   : > { %787 = vmatpush.bf16.msra.mxu3 %v956_v47 }
 0x3c2   : > { %v601_v49 = vpop.f32.mrf.mxu2 }
 0x3c3   : > { %v547_v51 = vpop.f32.mrf.mxu1  ;;  %v606_v55 = vmul.f32 %v1000_v54, %v601_v49 }
 0x3c6   : > { %608 = vrot.lane.b32.xlu0 %v494_v52, %s1032_s12  ;;  %v955_v52 = vld [vmem:[%s1219_s5] sm:$0xff]  ;;  %s287_s12 = scalar_lea.vmem %s1221_s7, %s891_s26 }
 0x3c7   : > { %788 = vmatpush.bf16.msra.mxu3 %v955_v52 }
 0x3ca   : > { %v603_v53 = vpop.f32.mrf.mxu2 }
 0x3ce   : > { %616 = vrot.lane.b32.xlu0 %v606_v55, %s1033_s13 }
 0x430   : > { %v613_v58 = vpop.permute.xlu0 %612 }
 0x438   : > { %v609_v60 = vpop.permute.xlu0 %608 }
 0x439   : > { %v619_v63 = vsel %vm385_vm6, %v438_v62, %v609_v60 }
 0x43a   : > { %v621_v1 = vsel %vm620_vm7, %v619_v63, %v613_v58 }
 0x440   : > { %v617_v0 = vpop.permute.xlu0 %616 }
 0x441   : > { %v623_v2 = vsel %vm622_vm8, %v621_v1, %v617_v0 }
 0x442   : > { %v624_v3 = vpack.c.bf16 %v623_v2, %v623_v2 }
 0x444   : > { %918 = vmatmul.msk.bf16.vlgmr.msra.gmra.mxu0 %vm314_vm0, %v624_v3 }
 0x4c1   : > { %v650_v5 = vpop.f32.mrf.mxu0 }
 0x4c2   : > { %v651_v6 = vadd.f32 %v650_v5, %v625_v4 }
 0x4c4   : > { %v654_v7 = vadd.f32 %v651_v6, %v1109_v32  ;;  %v953_v32 = vld [vmem:[%s1218_s4] sm:$0xff] }
 0x4c5   : > { %705 = vmatpush.bf16.msra.mxu1 %v953_v32 }
 0x4c6   : > { %v655_v8 = vsel %vm314_vm0, %v654_v7, 0.0 }
 0x4c7   : > { %656 = vadd.xlane.f32.xlu0 %v655_v8 }
 0x4c9   : > { %v652_v10 = vpop.f32.mrf.mxu0 }
 0x53a   : > { %v657_v11 = vpop.xlane.xlu0 %656 }
 0x53b   : > { %v658_v12 = vmul.f32 %v657_v11, %v1095_v9 }
 0x53d   : > { %v659_v13 = vsub.f32 %v654_v7, %v658_v12 }
 0x53f   : > { %v660_v14 = vmul.f32 %v659_v13, %v659_v13 }
 0x541   : > { %v661_v15 = vsel %vm314_vm0, %v660_v14, 0.0 }
 0x542   : > { %662 = vadd.xlane.f32.xlu2 %v661_v15  ;;  %v752_v15 = vperm.slane %v1117_v34, 5 }
 0x5b5   : > { %v663_v17 = vpop.xlane.xlu2 %662 }
 0x5b6   : > { %v664_v18 = vmul.f32 %v663_v17, %v1095_v9 }
 0x5b8   : > { %v665_v19 = vadd.f32 1e-07, %v664_v18 }
 0x5ba   : > { %1003 = vrsqrt.f32 %v665_v19  ;;  %vm672_vm10 = vweird.f32 %v665_v19 }
 0x5c0   : > { %v1004_v20 = vpop.eup %1003 }
 0x5c1   : > { %v667_v21 = vmul.f32 %v1004_v20, %v665_v19  ;;  %vm673_vm9 = vweird.f32 %v1004_v20 }
 0x5c2   : > { %vm674_vm11 = vmor %vm672_vm10, %vm673_vm9 }
 0x5c3   : > { %v668_v22 = vmul.f32 %v1004_v20, %v667_v21 }
 0x5c5   : > { %v669_v23 = vmul.f32 0.5, %v668_v22 }
 0x5c7   : > { %v670_v24 = vsub.f32 1.5, %v669_v23 }
 0x5c9   : > { %v671_v25 = vmul.f32 %v1004_v20, %v670_v24 }
 0x5cb   : > { %v675_v27 = vsel %vm674_vm11, %v1004_v20, %v671_v25 }
 0x5cc   : > { %v676_v29 = vmul.f32 %v675_v27, %v659_v13 }
 0x5ce   : > { %v678_v30 = vmul.f32 %v677_v26, %v676_v29 }
 0x5d0   : > { %v680_v31 = vadd.f32 %v679_v28, %v678_v30 }
 0x5d2   : > { %v681_v33 = vpack.c.bf16 %v680_v31, %v680_v31 }
 0x5d4   : > { %927 = vmatmul.msk.bf16.vlgmr.msra.gmra.mxu1 %vm314_vm0, %v681_v33 }
 0x651   : > { %v707_v36 = vpop.f32.mrf.mxu1 }
 0x652   : > { %v708_v37 = vadd.f32 %v707_v36, %v682_v35  ;;  %v817_v36 = vperm.slane %v1117_v34, 6 }
 0x654   : > { %v712_v38 = vmul.f32 0.70710677, %v708_v37  ;;  %v711_v11 = vmul.f32 0.5, %v708_v37 }
 0x656   : > { %v713_v39 = vand.u32 2147483647, %v712_v38  ;;  %vm746_vm1 = vcmp.lt.f32.partialorder %v712_v38, 0.0  ;;  %v819_v38 = vperm.slane %v1117_v34, 7 }
 0x658   : > { %v714_v40 = vmul.f32 0.3275911, %v713_v39  ;;  %v740_v57 = vsub.f32 0.0, %v713_v39 }
 0x659   : > { %v709_v41 = vpop.f32.mrf.mxu1 }
 0x65a   : > { %v715_v42 = vadd.f32 1.0, %v714_v40  ;;  %v741_v60 = vmul.f32 %v740_v57, %v713_v39 }
 0x65c   : > { %1005 = vrcp.f32 %v715_v42  ;;  %v727_v49 = vand.u32 2147483648, %v715_v42  ;;  %v725_v51 = vand.u32 2147483647, %v715_v42  ;;  %vm721_vm13 = vweird.f32 %v715_v42 }
 0x65d   : > { %v742_v63 = vmul.f32 1.442695, %v741_v60 }
 0x65e   : > { %v728_v54 = vor.u32 1.1754944e-38, %v727_v49  ;;  %vm726_vm15 = vcmp.eq.f32.partialorder %v725_v51, 8.507059e+37 }
 0x65f   : > { %1007 = vpow2.f32 %v742_v63 }
 0x662   : > { %v1006_v45 = vpop.eup %1005 }
 0x663   : > { %v717_v46 = vmul.f32 %v1006_v45, %v715_v42  ;;  %vm722_vm12 = vweird.f32 %v1006_v45 }
 0x664   : > { %vm723_vm14 = vmor %vm721_vm13, %vm722_vm12 }
 0x665   : > { %v718_v48 = vsub.f32 1.0, %v717_v46  ;;  %v1008_v5 = vpop.eup %1007 }
 0x667   : > { %v719_v50 = vmul.f32 %v1006_v45, %v718_v48 }
 0x669   : > { %v720_v53 = vadd.f32 %v1006_v45, %v719_v50 }
 0x66b   : > { %v724_v55 = vsel %vm723_vm14, %v1006_v45, %v720_v53 }
 0x66c   : > { %v729_v56 = vsel %vm726_vm15, %v728_v54, %v724_v55 }
 0x66d   : > { %v731_v58 = vmul.f32 1.0614054, %v729_v56 }
 0x66f   : > { %v928_v59 = vadd.f32 -1.4531521, %v731_v58 }
 0x671   : > { %v733_v61 = vmul.f32 %v928_v59, %v729_v56 }
 0x673   : > { %v734_v62 = vadd.f32 1.4214138, %v733_v61 }
 0x675   : > { %v735_v0 = vmul.f32 %v734_v62, %v729_v56 }
 0x677   : > { %v929_v1 = vadd.f32 -0.28449672, %v735_v0 }
 0x679   : > { %v737_v2 = vmul.f32 %v929_v1, %v729_v56 }
 0x67b   : > { %v738_v3 = vadd.f32 0.2548296, %v737_v2 }
 0x67d   : > { %v739_v4 = vmul.f32 %v738_v3, %v729_v56 }
 0x67f   : > { %v744_v6 = vmul.f32 %v1008_v5, %v739_v4 }
 0x681   : > { %v745_v7 = vsub.f32 1.0, %v744_v6 }
 0x683   : > { %v747_v8 = vsub.f32 0.0, %v745_v7 }
 0x685   : > { %v748_v10 = vsel %vm746_vm1, %v747_v8, %v745_v7 }
 0x686   : > { %v749_v12 = vadd.f32 1.0, %v748_v10 }
 0x688   : > { %v750_v13 = vmul.f32 %v749_v12, %v711_v11 }
 0x68a   : > { %v751_v14 = vpack.c.bf16 %v750_v13, %v750_v13 }
 0x68c   : > { %946 = vmatmul.msk.bf16.vlgmr.msra.gmra.mxu3 %vm777_vm2, %v751_v14 }
 0x70f   : > { %v790_v16 = vpop.f32.mrf.mxu3 }
 0x710   : > { %v791_v32 = vadd.f32 %v790_v16, %v752_v15 }
 0x712   : > { %v794_v17 = vadd.f32 %v791_v32, %v680_v31 }
 0x714   : > { %v795_v18 = vsel %vm314_vm0, %v794_v17, 0.0 }
 0x715   : > { %796 = vadd.xlane.f32.xlu1 %v795_v18 }
 0x717   : > { %v792_v19 = vpop.f32.mrf.mxu3 }
 0x788   : > { %v797_v20 = vpop.xlane.xlu1 %796 }
 0x789   : > { %v798_v21 = vmul.f32 %v797_v20, %v1095_v9 }
 0x78b   : > { %v799_v22 = vsub.f32 %v794_v17, %v798_v21 }
 0x78d   : > { %v800_v23 = vmul.f32 %v799_v22, %v799_v22 }
 0x78f   : > { %v801_v24 = vsel %vm314_vm0, %v800_v23, 0.0  ;;  %vm822_vm0 = vcmask 257024  }
 0x790   : > { %802 = vadd.xlane.f32.xlu2 %v801_v24 }
 0x803   : > { %v803_v25 = vpop.xlane.xlu2 %802 }
 0x804   : > { %v804_v26 = vmul.f32 %v803_v25, %v1095_v9 }
 0x806   : > { %v805_v27 = vadd.f32 1e-07, %v804_v26 }
 0x808   : > { %1009 = vrsqrt.f32 %v805_v27  ;;  %vm812_vm4 = vweird.f32 %v805_v27 }
 0x80e   : > { %v1010_v28 = vpop.eup %1009 }
 0x80f   : > { %v807_v29 = vmul.f32 %v1010_v28, %v805_v27  ;;  %vm813_vm3 = vweird.f32 %v1010_v28 }
 0x810   : > { %vm814_vm5 = vmor %vm812_vm4, %vm813_vm3 }
 0x811   : > { %v808_v30 = vmul.f32 %v1010_v28, %v807_v29 }
 0x813   : > { %v809_v31 = vmul.f32 0.5, %v808_v30 }
 0x815   : > { %v810_v33 = vsub.f32 1.5, %v809_v31 }
 0x817   : > { %v811_v35 = vmul.f32 %v1010_v28, %v810_v33 }
 0x819   : > { %v815_v37 = vsel %vm814_vm5, %v1010_v28, %v811_v35 }
 0x81a   : > { %v816_v39 = vmul.f32 %v815_v37, %v799_v22 }
 0x81c   : > { %v818_v40 = vmul.f32 %v817_v36, %v816_v39 }
 0x81e   : > { %v820_v9 = vadd.f32 %v819_v38, %v818_v40 }
 0x820   : > { %v821_v41 = vpack.c.bf16 %v820_v9, %v820_v9 }
 0x822   : > { %823 = vst.msk [vmem:[%s287_s12] sm:$0xf] %vm822_vm0, %v821_v41 }
 0x823 PF: > { %s17_s24 = sadd.s32 1, %s1017_s24  }
 0x824   : > { %p14_p4 = scmp.ge.s32.totalorder %s17_s24, 4  }
 0x826   :  { %16 = sbr.rel (!%p14_p4) target bundleno = 1 (0x1), region = 81 }

</bundles_post_ra>
